<compile_context>
chip_gen: v7x
topology: tpu7x:2x2x1
jax: 0.10.0
libtpu: 0.0.40
codegen_flags: <defaults>
</compile_context>

<pallas_src>
import jax
import jax.numpy as jnp
from jax.experimental import pallas as pl
from jax.experimental.pallas import tpu as pltpu


def self_attention_kernel(x_ref, w_ref, b_ref, gamma_ref,
                          out_ref, attn_ref,
                          q_scr, k_scr, v_scr):
    # x_ref:    (1, C, N)       one batch element, channels-major (lane dim = pixels)
    # w_ref:    (2*Cq + C, C)   [Wq; Wk; Wv] stacked, bf16
    # b_ref:    (2*Cq + C, 1)   [bq; bk; bv] stacked, f32
    # out_ref:  (1, C, TQ)      query tile of the output (lane-dense store)
    # attn_ref: (1, TQ, N)      attention rows for this query tile (bf16)
    # q_scr/k_scr: (Cq, N) bf16; v_scr: (C, N) bf16  -- per-batch projection cache
    tq = out_ref.shape[2]
    cq = q_scr.shape[0]
    qi = pl.program_id(1)
    start = pl.multiple_of(qi * tq, tq)

    # Fused Q/K/V projection, computed ONCE per batch element (qi == 0) and
    # cached in persistent VMEM scratch.  qi is an "arbitrary" grid axis, so it
    # iterates sequentially on one core and the cache remains valid for qi > 0.
    @pl.when(qi == 0)
    def _project():
        x_all = x_ref[0].astype(jnp.bfloat16)                            # (C, N)
        proj = jnp.dot(w_ref[...], x_all,
                       preferred_element_type=jnp.float32) + b_ref[...]  # (2Cq+C, N) f32
        q_scr[...] = proj[0:cq, :].astype(jnp.bfloat16)
        k_scr[...] = proj[cq:2 * cq, :].astype(jnp.bfloat16)
        v_scr[...] = proj[2 * cq:, :].astype(jnp.bfloat16)

    q = q_scr[:, pl.ds(start, tq)]                                       # (Cq, TQ) bf16

    # scores s[i, j] = q_i . k_j  (contract channel dim directly; no transposes).
    s = jax.lax.dot_general(
        q, k_scr[...],
        dimension_numbers=(((0,), (0,)), ((), ())),
        preferred_element_type=jnp.float32)                              # (TQ, N) f32

    # Numerically-stable softmax over keys (f32 elementwise math; EUP reciprocal).
    s = jnp.exp(s - jnp.max(s, axis=-1, keepdims=True))
    attn = s * pl.reciprocal(jnp.sum(s, axis=-1, keepdims=True), approx=True)
    attn_bf = attn.astype(jnp.bfloat16)
    attn_ref[0] = attn_bf                        # bf16 writeback halves HBM traffic

    # out[c, i] = sum_j v[c, j] * attn[i, j]   (== V @ attn^T), bf16 in / f32 acc.
    o = jax.lax.dot_general(
        v_scr[...], attn_bf,
        dimension_numbers=(((1,), (1,)), ((), ())),
        preferred_element_type=jnp.float32)                              # (C, TQ) f32

    gamma = gamma_ref[0, 0]                                              # scalar from SMEM
    out_ref[0] = gamma * o + x_ref[0, :, pl.ds(start, tq)]


def _physical_vmem_bytes():
    try:
        info = pltpu.get_tpu_info()
        return int(getattr(info, "vmem_capacity_bytes", 64 * 1024 * 1024))
    except Exception:
        return 64 * 1024 * 1024        # conservative default (v7x per-core VMEM)


def self_attention_pallas(x_nchw, params, tq=None, attn_dtype=jnp.bfloat16):
    """x_nchw: (B, C, W, H) float32.

    Returns (output (B, C, W, H) float32, attention (B, N, N) attn_dtype).
    """
    B, C, W, H = x_nchw.shape
    N = W * H
    Cq = params["wq"].shape[0]          # C // k
    assert C % 8 == 0, "C must be a multiple of 8 for unmasked f32 stores"

    # Free reshapes only -- no wrapper-side transposes.
    x_cn = x_nchw.reshape(B, C, N)
    wq = params["wq"].reshape(Cq, C)    # Conv2d 1x1 weight (Cout, Cin, 1, 1) -> (Cout, Cin)
    wk = params["wk"].reshape(Cq, C)
    wv = params["wv"].reshape(C, C)
    w_all = jnp.concatenate([wq, wk, wv], axis=0).astype(jnp.bfloat16)   # (2Cq+C, C)
    b_all = jnp.concatenate(
        [params["bq"], params["bk"], params["bv"]]
    ).reshape(2 * Cq + C, 1).astype(jnp.float32)
    gamma = params["gamma"].reshape(1, 1).astype(jnp.float32)

    # Generation-aware scoped-VMEM cap: ~96 MiB on v5e/v6e (128 MiB physical),
    # ~48 MiB on v7x (64 MiB physical).
    cap = min(_physical_vmem_bytes() * 3 // 4, 100 * 1024 * 1024)
    attn_bytes = jnp.dtype(attn_dtype).itemsize

    def vmem_estimate(t):
        return (2 * C * N * 4                               # x block (double-buffered)
                + 2 * (2 * Cq + C) * (C * 2 + 4)            # weights (bf16) + biases (f32)
                + 2 * C * t * 4                             # out tile (double-buffered)
                + 2 * t * N * attn_bytes                    # attn tile (double-buffered)
                + (2 * Cq + C) * N * 2                      # Q/K/V scratch cache (bf16)
                + max((2 * Cq + C) * N * 4 + C * N * 2,     # init temps (projection)
                      3 * t * N * 4 + C * t * 4))           # per-tile temps (softmax)

    if tq is None:
        candidates = [c for c in (512, 256, 128) if N % c == 0] or [N]
        tq = candidates[-1]
        for cand in candidates:                             # largest tile that fits
            if vmem_estimate(cand) + (8 << 20) <= cap:
                tq = cand
                break
    assert N % tq == 0, "W*H must be a multiple of the query tile"
    n_q = N // tq
    vmem_limit = int(max(min(vmem_estimate(tq) + (8 << 20), cap), 16 * 1024 * 1024))

    full = lambda r, c: pl.BlockSpec((r, c), lambda b, qi: (0, 0))

    grid_spec = pltpu.PrefetchScalarGridSpec(
        num_scalar_prefetch=0,
        grid=(B, n_q),
        in_specs=[
            pl.BlockSpec((1, C, N), lambda b, qi: (b, 0, 0)),     # x (all pixels for K/V)
            full(2 * Cq + C, C),                                  # [Wq;Wk;Wv] bf16
            full(2 * Cq + C, 1),                                  # [bq;bk;bv] f32
            pl.BlockSpec(memory_space=pltpu.MemorySpace.SMEM),    # gamma scalar
        ],
        out_specs=[
            pl.BlockSpec((1, C, tq), lambda b, qi: (b, 0, qi)),   # out (lane-dense)
            pl.BlockSpec((1, tq, N), lambda b, qi: (b, qi, 0)),   # attention rows (bf16)
        ],
        scratch_shapes=[
            pltpu.VMEM((Cq, N), jnp.bfloat16),                    # Q cache
            pltpu.VMEM((Cq, N), jnp.bfloat16),                    # K cache
            pltpu.VMEM((C, N), jnp.bfloat16),                     # V cache
        ],
    )

    out_cn, attn = pl.pallas_call(
        self_attention_kernel,
        out_shape=(
            jax.ShapeDtypeStruct((B, C, N), jnp.float32),
            jax.ShapeDtypeStruct((B, N, N), attn_dtype),
        ),
        grid_spec=grid_spec,
        compiler_params=pltpu.CompilerParams(
            # Batch axis parallel (megacore / v7x 2 TCs); qi axis arbitrary so the
            # per-batch Q/K/V scratch cache remains valid across query tiles.
            dimension_semantics=("parallel", "arbitrary"),
            vmem_limit_bytes=vmem_limit,
        ),
    )(x_cn, w_all, b_all, gamma)

    return out_cn.reshape(B, C, W, H), attn


def init_params(key, in_channels, k=8):
    Cq = in_channels // k
    ks = jax.random.split(key, 6)
    scale = 0.1
    return {
        "wq": scale * jax.random.normal(ks[0], (Cq, in_channels, 1, 1), jnp.float32),
        "bq": scale * jax.random.normal(ks[1], (Cq,), jnp.float32),
        "wk": scale * jax.random.normal(ks[2], (Cq, in_channels, 1, 1), jnp.float32),
        "bk": scale * jax.random.normal(ks[3], (Cq,), jnp.float32),
        "wv": scale * jax.random.normal(ks[4], (in_channels, in_channels, 1, 1), jnp.float32),
        "bv": scale * jax.random.normal(ks[5], (in_channels,), jnp.float32),
        # gamma is initialized to 0.0 in the PyTorch module; use a nonzero value
        # here so the attention path actually contributes to the output check.
        "gamma": jnp.array([0.5], jnp.float32),
    }


def _reference(x_nchw, params):
    """Pure-JAX f32 reference mirroring the PyTorch forward."""
    B, C, W, H = x_nchw.shape
    N = W * H
    Cq = params["wq"].shape[0]
    wq = params["wq"].reshape(Cq, C)
    wk = params["wk"].reshape(Cq, C)
    wv = params["wv"].reshape(C, C)
    xf = x_nchw.reshape(B, C, N)                                 # (B, C, N)
    q = jnp.einsum("oc,bcn->bon", wq, xf) + params["bq"][None, :, None]
    k = jnp.einsum("oc,bcn->bon", wk, xf) + params["bk"][None, :, None]
    v = jnp.einsum("oc,bcn->bon", wv, xf) + params["bv"][None, :, None]
    qk = jnp.einsum("bci,bcj->bij", q, k)                        # queries^T keys: (B, N, N)
    attn = jax.nn.softmax(qk, axis=-1)
    out = jnp.einsum("bcj,bij->bci", v, attn)                    # values @ attn^T
    out = params["gamma"][0] * out.reshape(B, C, W, H) + x_nchw
    return out, attn


if __name__ == "__main__":
    key = jax.random.PRNGKey(0)
    kx, kp = jax.random.split(key)

    B, C, W, H = 2, 32, 16, 16          # C must be divisible by k=8; N = 256
    x = jax.random.normal(kx, (B, C, W, H), jnp.float32)
    params = init_params(kp, C, k=8)

    out, attn = jax.block_until_ready(self_attention_pallas(x, params))

    out_ref, attn_ref = _reference(x, params)
    assert out.shape == (B, C, W, H) and attn.shape == (B, W * H, W * H)
    # Tolerances loosened vs. pure-f32: bf16 MXU inputs, bf16 attention
    # storage, and the approx reciprocal.
    assert jnp.allclose(out, out_ref, atol=1e-2, rtol=1e-2)
    assert jnp.allclose(attn.astype(jnp.float32), attn_ref, atol=2e-3, rtol=3e-2)

    print("KERNEL_OK")
</pallas_src>

<mosaic_0001>
module attributes {stable_mosaic.version = 11 : i64} {
  func.func @self_attention_kernel(%arg0: i32, %arg1: i32, %arg2: memref<1x32x256xf32, #tpu.memory_space<vmem>>, %arg3: memref<40x32xbf16, #tpu.memory_space<vmem>>, %arg4: memref<40x1xf32, #tpu.memory_space<vmem>>, %arg5: memref<1x1xf32, #tpu.memory_space<smem>>, %arg6: memref<1x32x256xf32, #tpu.memory_space<vmem>>, %arg7: memref<1x256x256xbf16, #tpu.memory_space<vmem>>, %arg8: memref<4x256xbf16, #tpu.memory_space<vmem>>, %arg9: memref<4x256xbf16, #tpu.memory_space<vmem>>, %arg10: memref<32x256xbf16, #tpu.memory_space<vmem>>) attributes {dimension_semantics = [#tpu.dimension_semantics<parallel>, #tpu.dimension_semantics<arbitrary>], iteration_bounds = array<i64: 2, 1>, scalar_prefetch = 0 : i64, scratch_operands = 3 : i64, tpu.core_type = #tpu.core_type<tc>, window_params = [{transform_indices = @transform_0, window_bounds = array<i64: 1, 32, 256>}, {pipeline_mode = #tpu.pipeline_mode<synchronous>, transform_indices = @transform_1, window_bounds = array<i64: 40, 32>}, {pipeline_mode = #tpu.pipeline_mode<synchronous>, transform_indices = @transform_2, window_bounds = array<i64: 40, 1>}, {transform_indices = @transform_3, window_bounds = array<i64: 1, 1>}, {transform_indices = @transform_4, window_bounds = array<i64: 1, 32, 256>}, {transform_indices = @transform_5, window_bounds = array<i64: 1, 256, 256>}]} {
    %c256_i32 = arith.constant 256 : i32
    %0 = arith.muli %arg1, %c256_i32 : i32
    %1 = tpu.assume_multiple %0, 256 : i32
    %c0_i32 = arith.constant 0 : i32
    %2 = arith.cmpi eq, %arg1, %c0_i32 : i32
    %3 = arith.extui %2 : i1 to i32
    %c0_i32_0 = arith.constant 0 : i32
    %4 = arith.cmpi ne, %3, %c0_i32_0 : i32
    scf.if %4 {
      %c0_18 = arith.constant 0 : index
      %c0_19 = arith.constant 0 : index
      %c0_20 = arith.constant 0 : index
      %35 = vector.load %arg2[%c0_18, %c0_19, %c0_20] : memref<1x32x256xf32, #tpu.memory_space<vmem>>, vector<1x32x256xf32>
      %36 = vector.shape_cast %35 : vector<1x32x256xf32> to vector<32x256xf32>
      %37 = arith.truncf %36 : vector<32x256xf32> to vector<32x256xbf16>
      %c0_21 = arith.constant 0 : index
      %c0_22 = arith.constant 0 : index
      %38 = vector.load %arg3[%c0_21, %c0_22] : memref<40x32xbf16, #tpu.memory_space<vmem>>, vector<40x32xbf16>
      %cst_23 = arith.constant dense<0.000000e+00> : vector<40x256xf32>
      %39 = tpu.matmul %38, %37, %cst_23 {dimension_numbers = #tpu.dot_dimension_numbers<[1], [0], [0], [1], [0, 0, 1, 1], [], []>} : vector<40x32xbf16>, vector<32x256xbf16>, vector<40x256xf32> -> vector<40x256xf32>
      %c0_24 = arith.constant 0 : index
      %c0_25 = arith.constant 0 : index
      %40 = vector.load %arg4[%c0_24, %c0_25] : memref<40x1xf32, #tpu.memory_space<vmem>>, vector<40x1xf32>
      %41 = vector.broadcast %40 : vector<40x1xf32> to vector<40x256xf32>
      %42 = arith.addf %39, %41 : vector<40x256xf32>
      %43 = vector.extract_strided_slice %42 {offsets = [0, 0], sizes = [4, 256], strides = [1, 1]} : vector<40x256xf32> to vector<4x256xf32>
      %44 = arith.truncf %43 : vector<4x256xf32> to vector<4x256xbf16>
      %c0_26 = arith.constant 0 : index
      %c0_27 = arith.constant 0 : index
      %45 = vector.load %arg8[%c0_26, %c0_27] : memref<4x256xbf16, #tpu.memory_space<vmem>>, vector<4x256xbf16>
      tpu.vector_store %arg8[%c0_26, %c0_27], %44 {strides = array<i32>} : memref<4x256xbf16, #tpu.memory_space<vmem>>, vector<4x256xbf16>,
      %46 = vector.extract_strided_slice %42 {offsets = [4, 0], sizes = [4, 256], strides = [1, 1]} : vector<40x256xf32> to vector<4x256xf32>
      %47 = arith.truncf %46 : vector<4x256xf32> to vector<4x256xbf16>
      %c0_28 = arith.constant 0 : index
      %c0_29 = arith.constant 0 : index
      %48 = vector.load %arg9[%c0_28, %c0_29] : memref<4x256xbf16, #tpu.memory_space<vmem>>, vector<4x256xbf16>
      tpu.vector_store %arg9[%c0_28, %c0_29], %47 {strides = array<i32>} : memref<4x256xbf16, #tpu.memory_space<vmem>>, vector<4x256xbf16>,
      %49 = vector.extract_strided_slice %42 {offsets = [8, 0], sizes = [32, 256], strides = [1, 1]} : vector<40x256xf32> to vector<32x256xf32>
      %50 = arith.truncf %49 : vector<32x256xf32> to vector<32x256xbf16>
      %c0_30 = arith.constant 0 : index
      %c0_31 = arith.constant 0 : index
      %51 = vector.load %arg10[%c0_30, %c0_31] : memref<32x256xbf16, #tpu.memory_space<vmem>>, vector<32x256xbf16>
      tpu.vector_store %arg10[%c0_30, %c0_31], %50 {strides = array<i32>} : memref<32x256xbf16, #tpu.memory_space<vmem>>, vector<32x256xbf16>,
    } else {
    }
    %c0 = arith.constant 0 : index
    %5 = arith.index_cast %1 : i32 to index
    %6 = vector.load %arg8[%c0, %5] : memref<4x256xbf16, #tpu.memory_space<vmem>>, vector<4x256xbf16>
    %c0_1 = arith.constant 0 : index
    %c0_2 = arith.constant 0 : index
    %7 = vector.load %arg9[%c0_1, %c0_2] : memref<4x256xbf16, #tpu.memory_space<vmem>>, vector<4x256xbf16>
    %cst = arith.constant dense<0.000000e+00> : vector<256x256xf32>
    %8 = tpu.matmul %6, %7, %cst {dimension_numbers = #tpu.dot_dimension_numbers<[0], [0], [1], [1], [0, 1, 1, 1], [], []>} : vector<4x256xbf16>, vector<4x256xbf16>, vector<256x256xf32> -> vector<256x256xf32>
    %cst_3 = arith.constant dense<0xFF800000> : vector<256xf32>
    %9 = vector.multi_reduction <maximumf>, %8, %cst_3 [1] : vector<256x256xf32> to vector<256xf32>
    %10 = vector.shape_cast %9 : vector<256xf32> to vector<256x1xf32>
    %11 = vector.broadcast %10 : vector<256x1xf32> to vector<256x256xf32>
    %12 = arith.subf %8, %11 : vector<256x256xf32>
    %13 = math.exp %12 : vector<256x256xf32>
    %cst_4 = arith.constant dense<0.000000e+00> : vector<256xf32>
    %14 = vector.multi_reduction <add>, %13, %cst_4 [1] : vector<256x256xf32> to vector<256xf32>
    %15 = vector.shape_cast %14 : vector<256xf32> to vector<256x1xf32>
    %16 = tpu.reciprocal %15 {approx = true} : vector<256x1xf32> -> vector<256x1xf32>
    %17 = vector.broadcast %16 : vector<256x1xf32> to vector<256x256xf32>
    %18 = arith.mulf %13, %17 : vector<256x256xf32>
    %19 = arith.truncf %18 : vector<256x256xf32> to vector<256x256xbf16>
    %c0_5 = arith.constant 0 : index
    %c0_6 = arith.constant 0 : index
    %c0_7 = arith.constant 0 : index
    %20 = vector.load %arg7[%c0_5, %c0_6, %c0_7] : memref<1x256x256xbf16, #tpu.memory_space<vmem>>, vector<1x256x256xbf16>
    %21 = vector.shape_cast %20 : vector<1x256x256xbf16> to vector<256x256xbf16>
    %22 = vector.shape_cast %19 : vector<256x256xbf16> to vector<1x256x256xbf16>
    tpu.vector_store %arg7[%c0_5, %c0_6, %c0_7], %22 {strides = array<i32>} : memref<1x256x256xbf16, #tpu.memory_space<vmem>>, vector<1x256x256xbf16>,
    %c0_8 = arith.constant 0 : index
    %c0_9 = arith.constant 0 : index
    %23 = vector.load %arg10[%c0_8, %c0_9] : memref<32x256xbf16, #tpu.memory_space<vmem>>, vector<32x256xbf16>
    %cst_10 = arith.constant dense<0.000000e+00> : vector<32x256xf32>
    %24 = tpu.matmul %23, %19, %cst_10 {dimension_numbers = #tpu.dot_dimension_numbers<[1], [1], [0], [0], [0, 0, 1, 0], [], []>} : vector<32x256xbf16>, vector<256x256xbf16>, vector<32x256xf32> -> vector<32x256xf32>
    %c0_11 = arith.constant 0 : index
    %c0_12 = arith.constant 0 : index
    %25 = memref.load %arg5[%c0_11, %c0_12] : memref<1x1xf32, #tpu.memory_space<smem>>
    %26 = vector.broadcast %25 : f32 to vector<32x256xf32>
    %27 = arith.mulf %26, %24 : vector<32x256xf32>
    %c0_13 = arith.constant 0 : index
    %c0_14 = arith.constant 0 : index
    %28 = arith.index_cast %1 : i32 to index
    %29 = vector.load %arg2[%c0_13, %c0_14, %28] : memref<1x32x256xf32, #tpu.memory_space<vmem>>, vector<1x32x256xf32>
    %30 = vector.shape_cast %29 : vector<1x32x256xf32> to vector<32x256xf32>
    %31 = arith.addf %27, %30 : vector<32x256xf32>
    %c0_15 = arith.constant 0 : index
    %c0_16 = arith.constant 0 : index
    %c0_17 = arith.constant 0 : index
    %32 = vector.load %arg6[%c0_15, %c0_16, %c0_17] : memref<1x32x256xf32, #tpu.memory_space<vmem>>, vector<1x32x256xf32>
    %33 = vector.shape_cast %32 : vector<1x32x256xf32> to vector<32x256xf32>
    %34 = vector.shape_cast %31 : vector<32x256xf32> to vector<1x32x256xf32>
    tpu.vector_store %arg6[%c0_15, %c0_16, %c0_17], %34 {strides = array<i32>} : memref<1x32x256xf32, #tpu.memory_space<vmem>>, vector<1x32x256xf32>,
    return
  }
  func.func @transform_0(%arg0: i32, %arg1: i32) -> (i32, i32, i32) {
    %c0_i32 = arith.constant 0 : i32
    %c0_i32_0 = arith.constant 0 : i32
    %c0_i32_1 = arith.constant 0 : i32
    return %arg0, %c0_i32, %c0_i32_0 : i32, i32, i32
  }
  func.func @transform_1(%arg0: i32, %arg1: i32) -> (i32, i32) {
    %c0_i32 = arith.constant 0 : i32
    %c0_i32_0 = arith.constant 0 : i32
    %c0_i32_1 = arith.constant 0 : i32
    return %c0_i32, %c0_i32_0 : i32, i32
  }
  func.func @transform_2(%arg0: i32, %arg1: i32) -> (i32, i32) {
    %c0_i32 = arith.constant 0 : i32
    %c0_i32_0 = arith.constant 0 : i32
    %c0_i32_1 = arith.constant 0 : i32
    return %c0_i32, %c0_i32_0 : i32, i32
  }
  func.func @transform_3(%arg0: i32, %arg1: i32) -> (i32, i32) {
    %c0_i32 = arith.constant 0 : i32
    %c0_i32_0 = arith.constant 0 : i32
    %c0_i32_1 = arith.constant 0 : i32
    return %c0_i32, %c0_i32_0 : i32, i32
  }
  func.func @transform_4(%arg0: i32, %arg1: i32) -> (i32, i32, i32) {
    %c0_i32 = arith.constant 0 : i32
    %c0_i32_0 = arith.constant 0 : i32
    return %arg0, %c0_i32, %arg1 : i32, i32, i32
  }
  func.func @transform_5(%arg0: i32, %arg1: i32) -> (i32, i32, i32) {
    %c0_i32 = arith.constant 0 : i32
    %c0_i32_0 = arith.constant 0 : i32
    return %arg0, %arg1, %c0_i32 : i32, i32, i32
  }
}

</mosaic_0001>

<bundles_post_ra>
// kernel: tpu_custom_call.1
= control target key start
LH: loop header
LB: loop body
LE: loop exit
PB: predicated region body
PF: predicated region fallthrough
CT: control target
= control target key end

     0   :  { %s3197_s0 = inlined_call_operand.hbm [shape: f32[2,32,256], index: 0, kind: input, shape index: {}]   ;;  %s3198_s1 = inlined_call_operand.vmem [shape: bf16[40,32], index: 1, kind: input, shape index: {}]   ;;  %s3199_s2 = inlined_call_operand.vmem [shape: f32[40,1], index: 2, kind: input, shape index: {}]   ;;  %s3200_s3 = inlined_call_operand.<no memory space> [shape: f32[1,1], index: 3, kind: input, shape index: {}]   ;;  %s3201_s4 = inlined_call_operand.hbm [shape: f32[2,32,256], index: 4, kind: output, shape index: {0}]   ;;  %s3202_s5 = inlined_call_operand.hbm [shape: bf16[2,256,256], index: 5, kind: output, shape index: {1}]  }
   0x1   :  { %11 = sst [smem:[#allocation5]] %s3200_s3 }
   0x2   :  { %12 = vsyncpa [#allocation7], 0 }
   0x3   :  { %14 = vsyncpa [#allocation7 + $0x1], 0 }
   0x4   :  { %15 = vsyncpa [#allocation8], 0 }
   0x5   :  { %17 = vsyncpa [#allocation8 + $0x1], 0 }
   0x6   :  { %18 = vsyncpa [#allocation11], 0 }
   0x7   :  { %20 = vsyncpa [#allocation11 + $0x1], 0  ;;  %s2309_s20 = smov 0   ;;  %s2311_s21 = smov 0  }
   0x8   :  { %s2313_s22 = smov 0   ;;  %s2315_s23 = smov 0  }
   0x9   :  { %s2317_s24 = smov 0   ;;  %s2319_s25 = smov 0  }
   0xa LB: > { %s1702_s3 = sadd.s32 4294967295, %s2263_s25   ;;  %s1703_s26 = sadd.s32 4294967294, %s2263_s25   ;;  %s2263_s25 = sphi %s2319_s25, %s26_s25   ;;  %s2259_s24 = sphi %s2317_s24, %s3310_s24   ;;  %s2255_s23 = sphi %s2315_s23, %s3309_s23   ;;  %s2251_s22 = sphi %s2313_s22, %s3308_s22   ;;  %s2247_s21 = sphi %s2311_s21, %s3307_s21   ;;  %s2243_s20 = sphi %s2309_s20, %s3306_s20  }
   0xb   : > { %s38_s27 = sadd.s32 1, %s2259_s24  ;;  %s45_s28 = sadd.s32 1, %s2251_s22 }
   0xc   : > { %p40_p0 = scmp.ge.s32.totalorder %s38_s27, 2  ;;  %p52_p1 = scmp.ne.s32.totalorder %s2251_s22, %s2247_s21 }
   0xd   : > { %p53_p2 = scmp.eq.s32.totalorder %s2263_s25, 0  ;;  %p58_p3 = scmp.ne.s32.totalorder %s2247_s21, %s2243_s20 }
   0xe   : > { %s3312_s27 = smov (%p40_p0, %s38_s27), 0  ;;  %p59_p5 = scmp.eq.s32.totalorder %s1702_s3, 0 }
   0xf   : > { %p2350_p4 = por %p53_p2, %p52_p1  ;;  %s42_s30 = ssub.s32 %s2259_s24, %s3312_s27 }
  0x10   : > { %p147_p6 = scmp.eq.s32.totalorder %s1702_s3, 1  ;;  %p43_p7 = scmp.eq.s32.totalorder %s42_s30, 0 }
  0x11   : > { %p2356_p8 = por %p59_p5, %p58_p3  ;;  %p153_p10 = scmp.eq.s32.totalorder %s1703_s26, 1 }
  0x12   : > { %p2360_p9 = por %p147_p6, %p52_p1  ;;  %p1864_p13 = scmp.lt.s32.totalorder %s2263_s25, 2 }
  0x13   : > { %s2365_s8 = scalar_select %p43_p7, %s2251_s22, %s45_s28  }
  0x14   : > { %s3234_s7 = scalar_select %p2360_p9, 1, 0 }
  0x15   : > { %p2367_p11 = por %p153_p10, %p58_p3  ;;  %s210_s10 = sand.u32 1, %s2251_s22  }
  0x16   : > { %s1706_s11 = sshll.u32 %s210_s10, 6  ;;  %s1780_s12 = sshll.u32 %s2259_s24, 10 }
  0x17   : > { %s3235_s9 = scalar_select %p2367_p11, 1, 0 }
  0x18   : > { %s2378_s15 = scalar_lea.hbm %s3197_s0, %s1780_s12  ;;  %s214_s16 = scalar_lea.vmem [#allocation6], %s1706_s11 }
  0x19   : > { %s221_s17 = sshll.u32 %s214_s16, 4  ;;  %p2384_p0 = pnand %p1864_p13, %p2350_p4  ;;  %s2380_s17 = int_to_ptr.vmem [resolvable:$true] %s221_s17 }
  0x1a   : > { %s2389_s19 = scalar_lea.sflag [#allocation7], %s210_s10  ;;  %s2119_s3 = scalar_lea.hbm %s2378_s15, 1024 }
  0x1b   : > { %p2120_p2 = scmp.ne.s32.totalorder %s2378_s15, %s2119_s3  ;;  %p2121_p3 = pneg %p2384_p0 }
  0x1c   : > { %s2124_s29 = scalar_lea.hbm %s3197_s0, 2048  ;;  %p2125_p4 = scmp.lt.u32.totalorder %s2378_s15, %s3197_s0 }
  0x1d   : > { %p2122_p5 = pnand %p2121_p3, %p2120_p2  ;;  %p2126_p7 = scmp.lt.u32.totalorder %s2124_s29, %s2119_s3 }
  0x1e   : > { %p2128_p13 = scmp.lt.u32.totalorder %s2119_s3, %s2378_s15 }
  0x1f   : > { %p2123_p6 = pneg %p2122_p5  ;;  %p2127_p10 = por %p2126_p7, %p2125_p4 }
  0x21   : > { %p2129_p12 = por %p2128_p13, %p2127_p10 }
  0x23   : > { %p2130_p1 = pnand %p2129_p12, %p2123_p6 }
  0x25   : > { %2133 = shalt.err (!%p2130_p1)
}
  0x26   : > { %s2134_s10 = scalar_lea.vmem %s2380_s17, 1024  ;;  %s2265_s12 = smov [#allocation6]  }
  0x27   : > { %p2135_p2 = scmp.ne.s32.totalorder %s2380_s17, %s2134_s10  ;;  %s2139_s13 = sshll.u32 %s2265_s12, 4  ;;  %s2140_s13 = int_to_ptr.vmem [resolvable:$false] %s2139_s13 }
  0x28   : > { %s2141_s14 = scalar_lea.vmem %s2140_s13, 2048  ;;  %p2142_p9 = scmp.lt.s32.totalorder %s2380_s17, %s2140_s13 }
  0x29   : > { %p2137_p5 = pnand %p2135_p2, %p2121_p3  ;;  %p2143_p4 = scmp.lt.s32.totalorder %s2141_s14, %s2134_s10 }
  0x2b   : > { %p2138_p11 = pneg %p2137_p5  ;;  %p2144_p7 = por %p2143_p4, %p2142_p9 }
  0x2d   : > { %p2145_p10 = pnand %p2144_p7, %p2138_p11 }
  0x2f   : > { %2148 = shalt.err (!%p2145_p10)
}
  0x30   : > { %s2266_s16 = smov 256   ;;  %s2267_s3 = smov 16  }
  0x31   : > { %1856 = dma.hbm_to_vmem [thread:$0]  (!%p2384_p0), %s2378_s15, 1024, %s2380_s17, %s2389_s19, %s2266_s16, %s2266_s16, %s2267_s3  }
  0x32   : > { %p229_p12 = scmp.lt.s32.totalorder %s2263_s25, 3  ;;  %p3237_p1 = scmp.ge.s32.totalorder %s2263_s25, 1 }
  0x34   : > { %p230_p3 = pnand %p3237_p1, %p229_p12 }
  0x36   : > { %233 = sbr.rel (%p230_p3) target bundleno = 1350 (0x546), region = 36 }
  0x3d   : > { %s2421_s26 = sand.u32 1, %s2247_s21  }
  0x3e   : > { %s1710_s28 = sshll.u32 %s2421_s26, 6  ;;  %s236_s29 = scalar_lea.sflag [#allocation7], %s2421_s26 }
  0x3f   : > { %s2427_s30 = scalar_lea.vmem [#allocation6], %s1710_s28 }
  0x40   : > { %2230 = dma.done.wait (%p2356_p8), %s236_s29, 1024  }
  0x41   : > { %2232 = vsyncadd (%p2356_p8), %s236_s29, 4294966272  ;;  %v2268_v0 = vmov 0   ;;  %v280_v1 = vld [vmem:[%s2427_s30 + $0x8] sm:$0xff]  ;;  %v282_v2 = vld [vmem:[%s2427_s30 + $0x18] sm:$0xff]  ;;  %vm339_vm0 = vcmask 261120   ;;  %v418_v17 = vlaneseq  ;;  %vm542_vm1 = vcmask 1041408  }
  0x42   : > { %381 = vmatprep.mubr.bf16.mxu0 %v2268_v0  ;;  %1922 = vset.pattern.permute.xlu0 %v2268_v0  ;;  %v279_v3 = vld [vmem:[%s2427_s30] sm:$0xff]  ;;  %v288_v4 = vpack.c.bf16 %v282_v2, %v280_v1  ;;  %v281_v5 = vld [vmem:[%s2427_s30 + $0x10] sm:$0xff]  ;;  %v284_v6 = vld [vmem:[%s2427_s30 + $0x28] sm:$0xff]  ;;  %v2269_v15 = vmov 1983009808   ;;  %vm493_vm2 = vcmask 31744  }
  0x43   : > { %581 = vmatprep.mubr.bf16.mxu1 %v2268_v0  ;;  %v286_v7 = vld [vmem:[%s2427_s30 + $0x38] sm:$0xff]  ;;  %v287_v8 = vpack.c.bf16 %v281_v5, %v279_v3  ;;  %v283_v10 = vld [vmem:[%s2427_s30 + $0x20] sm:$0xff]  ;;  %v285_v11 = vld [vmem:[%s2427_s30 + $0x30] sm:$0xff]  ;;  %v416_v16 = vunpack.c.l.s4 %v2269_v15  ;;  %v419_v20 = vshrl.u32 %v418_v17, 7  ;;  %s1712_s29 = sshll.u32 %s2421_s26, 8  ;;  %s1814_s11 = sshll.u32 %s2255_s23, 12 }
  0x44   : > { %v290_v9 = vpack.c.bf16 %v286_v7, %v284_v6  ;;  %349 = vmatprep.subr.bf16.mxu0 %v288_v4  ;;  %v296_v12 = vld [vmem:[%s3199_s2] sm:$0xff]  ;;  %v289_v13 = vpack.c.bf16 %v285_v11, %v283_v10  ;;  %s2945_s6 = scalar_lea.vmem [#allocation10], %s1712_s29  ;;  %s3093_s14 = scalar_lea.hbm %s3202_s5, %s1814_s11 }
  0x45   : > { %350 = vmatpush1.bf16.msra.mxu0 %v287_v8  ;;  %303 = vperm.xlu0 %1922, %v296_v12   ;;  %v1924_v14 = vld [vmem:[%s3198_s1] sm:$0xff]   ;;  %v417_v19 = vunpack.c.0.s8 %v416_v16  ;;  %s1579_s10 = sshll.u32 %s2945_s6, 4  ;;  %s1545_s16 = scalar_lea.sflag [#allocation11], %s2421_s26  ;;  %s3095_s10 = int_to_ptr.vmem [resolvable:$true] %s1579_s10 }
  0x46   : > { %351 = vmatprep.subr.bf16.mxu0 %v290_v9  ;;  %s2149_s3 = scalar_lea.vmem %s3095_s10, 4096  ;;  %p3303_p9 = scmp.ne.s32.totalorder %s3234_s7, 0 }
  0x47   : > { %v420_v25 = vsub.s32 %v417_v19, %v419_v20  ;;  %p2150_p8 = scmp.ne.s32.totalorder %s3095_s10, %s2149_s3  ;;  %s2270_s29 = smov [#allocation10]  }
  0x48   : > { %s2153_s15 = sshll.u32 %s2270_s29, 4  ;;  %s2154_s15 = int_to_ptr.vmem [resolvable:$false] %s2153_s15 }
  0x49   : > { %352 = vmatpush1.bf16.msra.mxu0 %v289_v13  ;;  %p2151_p11 = pnand %p2150_p8, %p3303_p9  ;;  %p2156_p6 = scmp.lt.s32.totalorder %s3095_s10, %s2154_s15 }
  0x4b   : > { %p2152_p0 = pneg %p2151_p11 }
  0x4c   : > { %1716 = vmatmul.mubr.msk.bf16.vlgmr.msra.gmra.mrb[0].mxu0 %vm339_vm0, %v1924_v14 }
  0x4d   : > { %391 = vmatprep.mubr.bf16.mxu0 %v2268_v0 }
  0xc4   : > { %v304_v18 = vpop.permute.xlu0 %303 }
 0x11f   : > { %v383_v21 = vpop.f32.mrb[0].mxu0 }
 0x120   : > { %v384_v22 = vadd.f32 %v383_v21, %v304_v18  ;;  %v385_v23 = vpop.f32.mrb[1].mxu0 }
 0x121   : > { %v386_v24 = vadd.f32 %v385_v23, %v304_v18  ;;  %v2452_v26 = vpop.f32.mrb[2].mxu0 }
 0x122   : > { %3238 = vst [vmem:[#allocation15_spill] sm:$0xff] %v2452_v26  ;;  %v2454_v27 = vpop.f32.mrb[3].mxu0 }
 0x123   : > { %3239 = vst [vmem:[#allocation16_spill] sm:$0xff] %v2454_v27  ;;  %v1719_v28 = vpack.c.bf16 %v386_v24, %v384_v22 }
 0x125   : > { %v421_v29 = vrot.slane %v1719_v28, %v420_v25  ;;  %1720 = vst.sshfl [vmem:[#allocation2] sm:$0x33 pattern:$0x76325410] %v1719_v28 }
 0x127   : > { %v424_v30 = vcombine.high %v421_v29, %v421_v29 }
 0x129   : > { %426 = vst [vmem:[#allocation3] sm:$0xf] %v424_v30 }
 0x12c   : > { %v1721_v31 = vld.sshfl [vmem:[#allocation2] sm:$0x33 pattern:$0x76325410] }
 0x12d   : > { %452 = vxpose.xlu0.c.b16.start.end [1/1] (short) %v1721_v31, 128  ;;  %v449_v32 = vcombine.high %v1721_v31, %v1721_v31 }
 0x12f   : > { %468 = vxpose.xlu1.c.b16.start.end [1/1] (short) %v449_v32, 128 }
 0x130   : > { %v1722_v33 = vld.sshfl [vmem:[#allocation3] sm:$0x33 pattern:$0x76325410] }
 0x131   : > { %v492_v34 = vcombine.high %v1722_v33, %v1722_v33  ;;  %v544_v35 = vsel %vm542_vm1, %v1722_v33, 0 }
 0x133   : > { %1723 = vmatprep.subr.msk.bf16.mxu1 %vm542_vm1, %v492_v34  ;;  %1923 = vset.pattern.permute.xlu1 %v2268_v0 }
 0x134   : > { %550 = vmatpush1.bf16.msra.mxu1 %v544_v35 }
 0x193   : > { %v460_v36 = vpop.trf.xlu0 }
 0x194   : > { %1724 = vmatmul.mubr.msk.bf16.vlgmr.msra.gmra.mrb[0].mxu1 %vm493_vm2, %v460_v36 }
 0x195   : > { %591 = vmatprep.mubr.bf16.mxu1 %v2268_v0  ;;  %v476_v44 = vpop.trf.xlu1 }
 0x197   : > { %v461_v37 = vpop.trf.xlu0 }
 0x199   : > { %v477_v45 = vpop.trf.xlu1 }
 0x19b   : > { %v462_v38 = vpop.trf.xlu0 }
 0x19c   : > { %1725 = vmatmul.mubr.msk.bf16.gmra.mrb[4].mxu1 %vm493_vm2, %v461_v37 }
 0x19d   : > { %601 = vmatprep.mubr.bf16.mxu1 %v2268_v0  ;;  %v478_v46 = vpop.trf.xlu1 }
 0x19f   : > { %v463_v39 = vpop.trf.xlu0 }
 0x1a1   : > { %v479_v47 = vpop.trf.xlu1 }
 0x1a3   : > { %v464_v40 = vpop.trf.xlu0 }
 0x1a4   : > { %1726 = vmatmul.mubr.msk.bf16.gmra.mrb[8].mxu1 %vm493_vm2, %v462_v38 }
 0x1a5   : > { %611 = vmatprep.mubr.bf16.mxu1 %v2268_v0  ;;  %v480_v48 = vpop.trf.xlu1 }
 0x1a7   : > { %v465_v41 = vpop.trf.xlu0 }
 0x1a9   : > { %v481_v49 = vpop.trf.xlu1 }
 0x1ab   : > { %v466_v42 = vpop.trf.xlu0 }
 0x1ac   : > { %1727 = vmatmul.mubr.msk.bf16.gmra.mrb[12].mxu1 %vm493_vm2, %v463_v39 }
 0x1ad   : > { %621 = vmatprep.mubr.bf16.mxu1 %v2268_v0  ;;  %v482_v50 = vpop.trf.xlu1 }
 0x1af   : > { %v467_v43 = vpop.trf.xlu0 }
 0x1b1   : > { %v483_v51 = vpop.trf.xlu1 }
 0x1b4   : > { %1728 = vmatmul.mubr.msk.bf16.gmra.mrb[16].mxu1 %vm493_vm2, %v464_v40 }
 0x1b5   : > { %631 = vmatprep.mubr.bf16.mxu1 %v2268_v0 }
 0x1bc   : > { %1729 = vmatmul.mubr.msk.bf16.gmra.mrb[20].mxu1 %vm493_vm2, %v465_v41 }
 0x1bd   : > { %641 = vmatprep.mubr.bf16.mxu1 %v2268_v0 }
 0x1c4   : > { %1730 = vmatmul.mubr.msk.bf16.gmra.mrb[24].mxu1 %vm493_vm2, %v466_v42 }
 0x1c5   : > { %651 = vmatprep.mubr.bf16.mxu1 %v2268_v0 }
 0x1cc   : > { %1731 = vmatmul.mubr.msk.bf16.gmra.mrb[28].mxu1 %vm493_vm2, %v467_v43 }
 0x1cd   : > { %661 = vmatprep.mubr.bf16.mxu1 %v2268_v0 }
 0x1d4   : > { %1732 = vmatmul.mubr.msk.bf16.gmra.mrb[32].mxu1 %vm493_vm2, %v476_v44 }
 0x1d5   : > { %671 = vmatprep.mubr.bf16.mxu1 %v2268_v0 }
 0x1dc   : > { %1733 = vmatmul.mubr.msk.bf16.gmra.mrb[36].mxu1 %vm493_vm2, %v477_v45  ;;  %v1925_v45 = vld [vmem:[%s3198_s1 + $0x8] sm:$0xff]  }
 0x1dd   : > { %681 = vmatprep.mubr.bf16.mxu1 %v2268_v0  ;;  %1717 = vmatmul.mubr.msk.bf16.gmra.mrb[4].mxu0 %vm339_vm0, %v1925_v45 }
 0x1de   : > { %401 = vmatprep.mubr.bf16.mxu0 %v2268_v0 }
 0x1e4   : > { %1734 = vmatmul.mubr.msk.bf16.gmra.mrb[40].mxu1 %vm493_vm2, %v478_v46 }
 0x1e5   : > { %691 = vmatprep.mubr.bf16.mxu1 %v2268_v0 }
 0x1ec   : > { %1735 = vmatmul.mubr.msk.bf16.gmra.mrb[44].mxu1 %vm493_vm2, %v479_v47 }
 0x1ed   : > { %701 = vmatprep.mubr.bf16.mxu1 %v2268_v0 }
 0x1f4   : > { %1736 = vmatmul.mubr.msk.bf16.gmra.mrb[48].mxu1 %vm493_vm2, %v480_v48 }
 0x1f5   : > { %711 = vmatprep.mubr.bf16.mxu1 %v2268_v0 }
 0x1fc   : > { %1737 = vmatmul.mubr.msk.bf16.gmra.mrb[52].mxu1 %vm493_vm2, %v481_v49 }
 0x1fd   : > { %721 = vmatprep.mubr.bf16.mxu1 %v2268_v0 }
 0x204   : > { %1738 = vmatmul.mubr.msk.bf16.gmra.mrb[56].mxu1 %vm493_vm2, %v482_v50 }
 0x205   : > { %731 = vmatprep.mubr.bf16.mxu1 %v2268_v0 }
 0x20c   : > { %1739 = vmatmul.mubr.msk.bf16.gmra.mrb[60].mxu1 %vm493_vm2, %v483_v51 }
 0x267   : > { %v2488_v52 = vpop.f32.mrb[0].mxu1 }
 0x268   : > { %v2490_v53 = vpop.f32.mrb[1].mxu1 }
 0x269   : > { %v2492_v54 = vpop.f32.mrb[2].mxu1  ;;  %v742_v55 = vmax.f32 %v2488_v52, %v2490_v53 }
 0x26a   : > { %v2496_v56 = vpop.f32.mrb[3].mxu1 }
 0x26b   : > { %743 = vmax.xlane.f32.xlu1 %v742_v55  ;;  %v745_v57 = vmax.f32 %v2492_v54, %v2496_v56 }
 0x26d   : > { %746 = vmax.xlane.f32.xlu0 %v745_v57 }
 0x26f   : > { %v2500_v58 = vpop.f32.mrb[4].mxu1 }
 0x270   : > { %v2502_v59 = vpop.f32.mrb[5].mxu1 }
 0x271   : > { %v2504_v60 = vpop.f32.mrb[6].mxu1  ;;  %v748_v61 = vmax.f32 %v2500_v58, %v2502_v59 }
 0x272   : > { %v2508_v62 = vpop.f32.mrb[7].mxu1 }
 0x273   : > { %749 = vmax.xlane.f32.xlu1 %v748_v61  ;;  %v751_v63 = vmax.f32 %v2504_v60, %v2508_v62 }
 0x277   : > { %752 = vmax.xlane.f32.xlu1 %v751_v63  ;;  %v2512_v1 = vpop.f32.mrb[8].mxu1 }
 0x278   : > { %v2514_v2 = vpop.f32.mrb[9].mxu1 }
 0x279   : > { %v2516_v3 = vpop.f32.mrb[10].mxu1  ;;  %v754_v4 = vmax.f32 %v2512_v1, %v2514_v2 }
 0x27a   : > { %v2520_v5 = vpop.f32.mrb[11].mxu1 }
 0x27b   : > { %755 = vmax.xlane.f32.xlu1 %v754_v4  ;;  %v757_v6 = vmax.f32 %v2516_v3, %v2520_v5 }
 0x27f   : > { %758 = vmax.xlane.f32.xlu1 %v757_v6  ;;  %v2524_v7 = vpop.f32.mrb[12].mxu1 }
 0x280   : > { %v2526_v8 = vpop.f32.mrb[13].mxu1 }
 0x281   : > { %v2528_v9 = vpop.f32.mrb[14].mxu1  ;;  %v760_v10 = vmax.f32 %v2524_v7, %v2526_v8 }
 0x282   : > { %v2532_v11 = vpop.f32.mrb[15].mxu1 }
 0x283   : > { %761 = vmax.xlane.f32.xlu1 %v760_v10  ;;  %v763_v12 = vmax.f32 %v2528_v9, %v2532_v11 }
 0x287   : > { %764 = vmax.xlane.f32.xlu1 %v763_v12  ;;  %v2536_v13 = vpop.f32.mrb[16].mxu1 }
 0x288   : > { %v2538_v14 = vpop.f32.mrb[17].mxu1 }
 0x289   : > { %v2540_v15 = vpop.f32.mrb[18].mxu1  ;;  %v766_v16 = vmax.f32 %v2536_v13, %v2538_v14 }
 0x28a   : > { %v2544_v17 = vpop.f32.mrb[19].mxu1 }
 0x28b   : > { %767 = vmax.xlane.f32.xlu1 %v766_v16  ;;  %v769_v18 = vmax.f32 %v2540_v15, %v2544_v17 }
 0x28f   : > { %770 = vmax.xlane.f32.xlu1 %v769_v18  ;;  %v2548_v19 = vpop.f32.mrb[20].mxu1 }
 0x290   : > { %v2550_v20 = vpop.f32.mrb[21].mxu1 }
 0x291   : > { %v2552_v21 = vpop.f32.mrb[22].mxu1  ;;  %v772_v22 = vmax.f32 %v2548_v19, %v2550_v20 }
 0x292   : > { %v2556_v23 = vpop.f32.mrb[23].mxu1 }
 0x293   : > { %773 = vmax.xlane.f32.xlu0 %v772_v22  ;;  %v775_v24 = vmax.f32 %v2552_v21, %v2556_v23 }
 0x295   : > { %776 = vmax.xlane.f32.xlu1 %v775_v24 }
 0x297   : > { %v2560_v25 = vpop.f32.mrb[24].mxu1 }
 0x298   : > { %v2562_v28 = vpop.f32.mrb[25].mxu1 }
 0x299   : > { %v2564_v29 = vpop.f32.mrb[26].mxu1  ;;  %v778_v30 = vmax.f32 %v2560_v25, %v2562_v28 }
 0x29a   : > { %v2568_v31 = vpop.f32.mrb[27].mxu1 }
 0x29b   : > { %779 = vmax.xlane.f32.xlu0 %v778_v30  ;;  %v781_v32 = vmax.f32 %v2564_v29, %v2568_v31 }
 0x29d   : > { %782 = vmax.xlane.f32.xlu1 %v781_v32 }
 0x29f   : > { %v2572_v33 = vpop.f32.mrb[28].mxu1 }
 0x2a0   : > { %v2574_v34 = vpop.f32.mrb[29].mxu1 }
 0x2a1   : > { %v2576_v35 = vpop.f32.mrb[30].mxu1  ;;  %v784_v36 = vmax.f32 %v2572_v33, %v2574_v34 }
 0x2a2   : > { %v2580_v37 = vpop.f32.mrb[31].mxu1 }
 0x2a3   : > { %785 = vmax.xlane.f32.xlu0 %v784_v36  ;;  %v787_v38 = vmax.f32 %v2576_v35, %v2580_v37 }
 0x2a5   : > { %788 = vmax.xlane.f32.xlu1 %v787_v38 }
 0x2a7   : > { %v2584_v39 = vpop.f32.mrb[32].mxu1 }
 0x2a8   : > { %v2586_v40 = vpop.f32.mrb[33].mxu1 }
 0x2a9   : > { %v2588_v41 = vpop.f32.mrb[34].mxu1  ;;  %v790_v42 = vmax.f32 %v2584_v39, %v2586_v40 }
 0x2aa   : > { %v2592_v43 = vpop.f32.mrb[35].mxu1 }
 0x2ab   : > { %791 = vmax.xlane.f32.xlu0 %v790_v42  ;;  %v793_v44 = vmax.f32 %v2588_v41, %v2592_v43 }
 0x2ad   : > { %794 = vmax.xlane.f32.xlu1 %v793_v44 }
 0x2af   : > { %v2601_v46 = vpop.f32.mrb[36].mxu1 }
 0x2b0   : > { %v2603_v47 = vpop.f32.mrb[37].mxu1 }
 0x2b1   : > { %v2605_v48 = vpop.f32.mrb[38].mxu1  ;;  %v796_v49 = vmax.f32 %v2601_v46, %v2603_v47 }
 0x2b2   : > { %v2609_v50 = vpop.f32.mrb[39].mxu1 }
 0x2b3   : > { %797 = vmax.xlane.f32.xlu0 %v796_v49  ;;  %v799_v51 = vmax.f32 %v2605_v48, %v2609_v50 }
 0x2b5   : > { %800 = vmax.xlane.f32.xlu1 %v799_v51 }
 0x2b7   : > { %v2613_v55 = vpop.f32.mrb[40].mxu1 }
 0x2b8   : > { %v2615_v57 = vpop.f32.mrb[41].mxu1 }
 0x2b9   : > { %v2617_v0 = vpop.f32.mrb[42].mxu1  ;;  %v802_v61 = vmax.f32 %v2613_v55, %v2615_v57 }
 0x2ba   : > { %v2621_v63 = vpop.f32.mrb[43].mxu1 }
 0x2bb   : > { %803 = vmax.xlane.f32.xlu0 %v802_v61  ;;  %v805_v4 = vmax.f32 %v2617_v0, %v2621_v63 }
 0x2bd   : > { %806 = vmax.xlane.f32.xlu1 %v805_v4 }
 0x2bf   : > { %v2625_v6 = vpop.f32.mrb[44].mxu1 }
 0x2c0   : > { %v2627_v10 = vpop.f32.mrb[45].mxu1 }
 0x2c1   : > { %v2629_v12 = vpop.f32.mrb[46].mxu1  ;;  %v808_v16 = vmax.f32 %v2625_v6, %v2627_v10 }
 0x2c2   : > { %v2633_v18 = vpop.f32.mrb[47].mxu1 }
 0x2c3   : > { %3240 = vst [vmem:[#allocation17_spill] sm:$0xff] %v2633_v18  ;;  %809 = vmax.xlane.f32.xlu0 %v808_v16  ;;  %v811_v22 = vmax.f32 %v2629_v12, %v2633_v18 }
 0x2c5   : > { %812 = vmax.xlane.f32.xlu1 %v811_v22 }
 0x2c7   : > { %v2637_v24 = vpop.f32.mrb[48].mxu1 }
 0x2c8   : > { %3241 = vst [vmem:[#allocation18_spill] sm:$0xff] %v2637_v24  ;;  %v2639_v30 = vpop.f32.mrb[49].mxu1 }
 0x2c9   : > { %3242 = vst [vmem:[#allocation19_spill] sm:$0xff] %v2639_v30  ;;  %v2641_v32 = vpop.f32.mrb[50].mxu1  ;;  %v814_v36 = vmax.f32 %v2637_v24, %v2639_v30 }
 0x2ca   : > { %3243 = vst [vmem:[#allocation20_spill] sm:$0xff] %v2641_v32  ;;  %v2645_v38 = vpop.f32.mrb[51].mxu1 }
 0x2cb   : > { %3244 = vst [vmem:[#allocation21_spill] sm:$0xff] %v2645_v38  ;;  %815 = vmax.xlane.f32.xlu0 %v814_v36  ;;  %v817_v42 = vmax.f32 %v2641_v32, %v2645_v38 }
 0x2cd   : > { %818 = vmax.xlane.f32.xlu1 %v817_v42 }
 0x2cf   : > { %v2649_v44 = vpop.f32.mrb[52].mxu1 }
 0x2d0   : > { %3245 = vst [vmem:[#allocation22_spill] sm:$0xff] %v2649_v44  ;;  %v2651_v45 = vpop.f32.mrb[53].mxu1 }
 0x2d1   : > { %3246 = vst [vmem:[#allocation23_spill] sm:$0xff] %v2651_v45  ;;  %v2653_v49 = vpop.f32.mrb[54].mxu1  ;;  %v820_v51 = vmax.f32 %v2649_v44, %v2651_v45 }
 0x2d2   : > { %3247 = vst [vmem:[#allocation24_spill] sm:$0xff] %v2653_v49  ;;  %v2657_v61 = vpop.f32.mrb[55].mxu1 }
 0x2d3   : > { %3248 = vst [vmem:[#allocation25_spill] sm:$0xff] %v2657_v61  ;;  %821 = vmax.xlane.f32.xlu0 %v820_v51  ;;  %v823_v4 = vmax.f32 %v2653_v49, %v2657_v61 }
 0x2d5   : > { %824 = vmax.xlane.f32.xlu1 %v823_v4 }
 0x2d7   : > { %v2661_v16 = vpop.f32.mrb[56].mxu1 }
 0x2d8   : > { %3249 = vst [vmem:[#allocation26_spill] sm:$0xff] %v2661_v16  ;;  %v2663_v22 = vpop.f32.mrb[57].mxu1 }
 0x2d9   : > { %3250 = vst [vmem:[#allocation27_spill] sm:$0xff] %v2663_v22  ;;  %v2665_v36 = vpop.f32.mrb[58].mxu1  ;;  %v826_v42 = vmax.f32 %v2661_v16, %v2663_v22  ;;  %v1926_v16 = vld [vmem:[%s3198_s1 + $0x10] ss:$0 sps:$4 sm:$0xff]  }
 0x2da   : > { %3251 = vst [vmem:[#allocation28_spill] sm:$0xff] %v2665_v36  ;;  %v2669_v27 = vpop.f32.mrb[59].mxu1  ;;  %1718 = vmatmul.mubr.msk.bf16.gmra.mrb[8].mxu0 %vm339_vm0, %v1926_v16 }
 0x2db   : > { %3252 = vst [vmem:[#allocation29_spill] sm:$0xff] %v2669_v27  ;;  %v829_v26 = vmax.f32 %v2665_v36, %v2669_v27 }
 0x2dd   : > { %830 = vmax.xlane.f32.xlu1 %v829_v26 }
 0x2df   : > { %v2673_v51 = vpop.f32.mrb[60].mxu1 }
 0x2e0   : > { %v2675_v45 = vpop.f32.mrb[61].mxu1 }
 0x2e1   : > { %v2677_v4 = vpop.f32.mrb[62].mxu1 }
 0x2e2   : > { %3253 = vst [vmem:[#allocation30_spill] sm:$0xff] %v2677_v4  ;;  %v2681_v49 = vpop.f32.mrb[63].mxu1 }
 0x2e3   : > { %3254 = vst [vmem:[#allocation31_spill] sm:$0xff] %v2681_v49  ;;  %v835_v22 = vmax.f32 %v2677_v4, %v2681_v49 }
 0x2f8   : > { %v744_v26 = vpop.xlane.xlu1 %743 }
 0x2f9   : > { %v838_v27 = vsub.f32 %v2488_v52, %v744_v26  ;;  %v839_v36 = vsub.f32 %v2490_v53, %v744_v26 }
 0x2fa   : > { %v747_v44 = vpop.xlane.xlu0 %746 }
 0x2fb   : > { %v902_v38 = vmul.f32 1.442695, %v838_v27  ;;  %v904_v32 = vmul.f32 1.442695, %v839_v36  ;;  %v840_v61 = vsub.f32 %v2492_v54, %v747_v44  ;;  %v841_v30 = vsub.f32 %v2496_v56, %v747_v44 }
 0x2fd   : > { %1927 = vpow2.f32 %v902_v38  ;;  %v906_v49 = vmul.f32 1.442695, %v840_v61  ;;  %v908_v4 = vmul.f32 1.442695, %v841_v30 }
 0x2fe   : > { %1929 = vpow2.f32 %v904_v32 }
 0x2ff   : > { %1931 = vpow2.f32 %v906_v49 }
 0x300   : > { %1933 = vpow2.f32 %v908_v4  ;;  %v750_v24 = vpop.xlane.xlu1 %749 }
 0x301   : > { %v842_v16 = vsub.f32 %v2500_v58, %v750_v24  ;;  %v843_v52 = vsub.f32 %v2502_v59, %v750_v24 }
 0x303   : > { %v910_v18 = vmul.f32 1.442695, %v842_v16  ;;  %v912_v53 = vmul.f32 1.442695, %v843_v52 }
 0x304   : > { %v753_v26 = vpop.xlane.xlu1 %752 }
 0x305   : > { %1935 = vpow2.f32 %v910_v18  ;;  %v844_v27 = vsub.f32 %v2504_v60, %v753_v26  ;;  %v845_v54 = vsub.f32 %v2508_v62, %v753_v26 }
 0x306   : > { %1937 = vpow2.f32 %v912_v53 }
 0x307   : > { %v2697_v56 = vpop.eup %1927  ;;  %v914_v30 = vmul.f32 1.442695, %v844_v27  ;;  %v916_v32 = vmul.f32 1.442695, %v845_v54 }
 0x308   : > { %v2699_v38 = vpop.eup %1929  ;;  %v756_v44 = vpop.xlane.xlu1 %755 }
 0x309   : > { %v2701_v49 = vpop.eup %1931  ;;  %1939 = vpow2.f32 %v914_v30  ;;  %v846_v58 = vsub.f32 %v2512_v1, %v756_v44  ;;  %v847_v59 = vsub.f32 %v2514_v2, %v756_v44  ;;  %v1030_v60 = vadd.f32 %v2699_v38, %v2697_v56 }
 0x30a   : > { %v2707_v18 = vpop.eup %1933  ;;  %1941 = vpow2.f32 %v916_v32 }
 0x30b   : > { %v918_v62 = vmul.f32 1.442695, %v846_v58  ;;  %v920_v24 = vmul.f32 1.442695, %v847_v59  ;;  %1031 = vadd.xlane.f32.xlu0 %v1030_v60  ;;  %v1033_v61 = vadd.f32 %v2707_v18, %v2701_v49 }
 0x30c   : > { %v759_v36 = vpop.xlane.xlu1 %758 }
 0x30d   : > { %1943 = vpow2.f32 %v918_v62  ;;  %v848_v4 = vsub.f32 %v2516_v3, %v759_v36  ;;  %v849_v1 = vsub.f32 %v2520_v5, %v759_v36  ;;  %1034 = vadd.xlane.f32.xlu1 %v1033_v61  ;;  %v3255_v62 = vmax.f32 %v2673_v51, %v2675_v45 }
 0x30e   : > { %1945 = vpow2.f32 %v920_v24 }
 0x30f   : > { %v2713_v2 = vpop.eup %1935  ;;  %v922_v16 = vmul.f32 1.442695, %v848_v4  ;;  %v924_v52 = vmul.f32 1.442695, %v849_v1  ;;  %827 = vmax.xlane.f32.xlu0 %v826_v42 }
 0x310   : > { %v2715_v53 = vpop.eup %1937  ;;  %v762_v26 = vpop.xlane.xlu1 %761 }
 0x311   : > { %1947 = vpow2.f32 %v922_v16  ;;  %v850_v27 = vsub.f32 %v2524_v7, %v762_v26  ;;  %v851_v54 = vsub.f32 %v2526_v8, %v762_v26  ;;  %836 = vmax.xlane.f32.xlu1 %v835_v22  ;;  %v1036_v3 = vadd.f32 %v2715_v53, %v2713_v2 }
 0x312   : > { %1949 = vpow2.f32 %v924_v52 }
 0x313   : > { %v2721_v5 = vpop.eup %1939  ;;  %v926_v30 = vmul.f32 1.442695, %v850_v27  ;;  %v928_v32 = vmul.f32 1.442695, %v851_v54  ;;  %1037 = vadd.xlane.f32.xlu0 %v1036_v3 }
 0x314   : > { %v2723_v44 = vpop.eup %1941  ;;  %v765_v42 = vpop.xlane.xlu1 %764 }
 0x315   : > { %1951 = vpow2.f32 %v926_v30  ;;  %v852_v58 = vsub.f32 %v2528_v9, %v765_v42  ;;  %v853_v7 = vsub.f32 %v2532_v11, %v765_v42  ;;  %v1039_v8 = vadd.f32 %v2723_v44, %v2721_v5 }
 0x316   : > { %1953 = vpow2.f32 %v928_v32 }
 0x317   : > { %v2729_v22 = vpop.eup %1943  ;;  %v930_v59 = vmul.f32 1.442695, %v852_v58  ;;  %v932_v60 = vmul.f32 1.442695, %v853_v7  ;;  %833 = vmax.xlane.f32.xlu0 %v3255_v62  ;;  %1040 = vadd.xlane.f32.xlu1 %v1039_v8 }
 0x318   : > { %v2734_v24 = vpop.eup %1945  ;;  %v768_v61 = vpop.xlane.xlu1 %767 }
 0x319   : > { %1955 = vpow2.f32 %v930_v59  ;;  %v854_v9 = vsub.f32 %v2536_v13, %v768_v61  ;;  %v855_v11 = vsub.f32 %v2538_v14, %v768_v61  ;;  %v1042_v36 = vadd.f32 %v2734_v24, %v2729_v22 }
 0x31a   : > { %1957 = vpow2.f32 %v932_v60 }
 0x31b   : > { %v2740_v4 = vpop.eup %1947  ;;  %v934_v1 = vmul.f32 1.442695, %v854_v9  ;;  %v936_v16 = vmul.f32 1.442695, %v855_v11  ;;  %1043 = vadd.xlane.f32.xlu0 %v1042_v36 }
 0x31c   : > { %v2742_v52 = vpop.eup %1949  ;;  %v771_v26 = vpop.xlane.xlu1 %770 }
 0x31d   : > { %1959 = vpow2.f32 %v934_v1  ;;  %v856_v27 = vsub.f32 %v2540_v15, %v771_v26  ;;  %v857_v54 = vsub.f32 %v2544_v17, %v771_v26  ;;  %v1045_v13 = vadd.f32 %v2742_v52, %v2740_v4 }
 0x31e   : > { %1961 = vpow2.f32 %v936_v16 }
 0x31f   : > { %v2748_v14 = vpop.eup %1951  ;;  %v938_v3 = vmul.f32 1.442695, %v856_v27  ;;  %v940_v30 = vmul.f32 1.442695, %v857_v54  ;;  %1046 = vadd.xlane.f32.xlu1 %v1045_v13 }
 0x320   : > { %v2750_v32 = vpop.eup %1953  ;;  %v774_v42 = vpop.xlane.xlu0 %773 }
 0x321   : > { %1963 = vpow2.f32 %v938_v3  ;;  %v858_v58 = vsub.f32 %v2548_v19, %v774_v42  ;;  %v859_v7 = vsub.f32 %v2550_v20, %v774_v42  ;;  %v1048_v15 = vadd.f32 %v2750_v32, %v2748_v14 }
 0x322   : > { %1965 = vpow2.f32 %v940_v30  ;;  %v777_v17 = vpop.xlane.xlu1 %776 }
 0x323   : > { %v2756_v8 = vpop.eup %1955  ;;  %v942_v59 = vmul.f32 1.442695, %v858_v58  ;;  %v944_v60 = vmul.f32 1.442695, %v859_v7  ;;  %v860_v62 = vsub.f32 %v2552_v21, %v777_v17  ;;  %v861_v61 = vsub.f32 %v2556_v23, %v777_v17  ;;  %1049 = vadd.xlane.f32.xlu0 %v1048_v15 }
 0x324   : > { %v2760_v9 = vpop.eup %1957 }
 0x325   : > { %1967 = vpow2.f32 %v942_v59  ;;  %v946_v19 = vmul.f32 1.442695, %v860_v62  ;;  %v948_v11 = vmul.f32 1.442695, %v861_v61  ;;  %v1051_v20 = vadd.f32 %v2760_v9, %v2756_v8 }
 0x326   : > { %1969 = vpow2.f32 %v944_v60 }
 0x327   : > { %v2764_v36 = vpop.eup %1959  ;;  %1971 = vpow2.f32 %v946_v19  ;;  %1052 = vadd.xlane.f32.xlu1 %v1051_v20 }
 0x328   : > { %v2766_v1 = vpop.eup %1961  ;;  %1973 = vpow2.f32 %v948_v11  ;;  %v780_v21 = vpop.xlane.xlu0 %779 }
 0x329   : > { %v862_v23 = vsub.f32 %v2560_v25, %v780_v21  ;;  %v863_v16 = vsub.f32 %v2562_v28, %v780_v21  ;;  %v1054_v26 = vadd.f32 %v2766_v1, %v2764_v36 }
 0x32a   : > { %v783_v27 = vpop.xlane.xlu1 %782 }
 0x32b   : > { %v2772_v54 = vpop.eup %1963  ;;  %v950_v13 = vmul.f32 1.442695, %v862_v23  ;;  %v952_v3 = vmul.f32 1.442695, %v863_v16  ;;  %v864_v30 = vsub.f32 %v2564_v29, %v783_v27  ;;  %v865_v42 = vsub.f32 %v2568_v31, %v783_v27  ;;  %1055 = vadd.xlane.f32.xlu0 %v1054_v26 }
 0x32c   : > { %v2776_v58 = vpop.eup %1965 }
 0x32d   : > { %1975 = vpow2.f32 %v950_v13  ;;  %v954_v7 = vmul.f32 1.442695, %v864_v30  ;;  %v956_v25 = vmul.f32 1.442695, %v865_v42  ;;  %v1057_v28 = vadd.f32 %v2776_v58, %v2772_v54 }
 0x32e   : > { %1977 = vpow2.f32 %v952_v3 }
 0x32f   : > { %v2780_v15 = vpop.eup %1967  ;;  %1979 = vpow2.f32 %v954_v7  ;;  %1058 = vadd.xlane.f32.xlu1 %v1057_v28 }
 0x330   : > { %v2782_v17 = vpop.eup %1969  ;;  %1981 = vpow2.f32 %v956_v25  ;;  %v786_v29 = vpop.xlane.xlu0 %785 }
 0x331   : > { %v2784_v59 = vpop.eup %1971  ;;  %v866_v31 = vsub.f32 %v2572_v33, %v786_v29  ;;  %v867_v60 = vsub.f32 %v2574_v34, %v786_v29  ;;  %v1060_v62 = vadd.f32 %v2782_v17, %v2780_v15 }
 0x332   : > { %v2790_v61 = vpop.eup %1973  ;;  %v789_v19 = vpop.xlane.xlu1 %788 }
 0x333   : > { %v958_v11 = vmul.f32 1.442695, %v866_v31  ;;  %v960_v20 = vmul.f32 1.442695, %v867_v60  ;;  %v868_v21 = vsub.f32 %v2576_v35, %v789_v19  ;;  %v869_v23 = vsub.f32 %v2580_v37, %v789_v19  ;;  %1061 = vadd.xlane.f32.xlu0 %v1060_v62 }
 0x334   : > { %v1063_v16 = vadd.f32 %v2790_v61, %v2784_v59 }
 0x335   : > { %1983 = vpow2.f32 %v958_v11  ;;  %v962_v33 = vmul.f32 1.442695, %v868_v21  ;;  %v964_v26 = vmul.f32 1.442695, %v869_v23 }
 0x336   : > { %1985 = vpow2.f32 %v960_v20  ;;  %1064 = vadd.xlane.f32.xlu1 %v1063_v16 }
 0x337   : > { %v2796_v34 = vpop.eup %1975  ;;  %1987 = vpow2.f32 %v962_v33 }
 0x338   : > { %v2798_v27 = vpop.eup %1977  ;;  %1989 = vpow2.f32 %v964_v26  ;;  %v792_v13 = vpop.xlane.xlu0 %791 }
 0x339   : > { %v2800_v3 = vpop.eup %1979  ;;  %v870_v35 = vsub.f32 %v2584_v39, %v792_v13  ;;  %v871_v37 = vsub.f32 %v2586_v40, %v792_v13  ;;  %v1066_v30 = vadd.f32 %v2798_v27, %v2796_v34 }
 0x33a   : > { %v2806_v42 = vpop.eup %1981  ;;  %v795_v7 = vpop.xlane.xlu1 %794 }
 0x33b   : > { %v966_v25 = vmul.f32 1.442695, %v870_v35  ;;  %v968_v28 = vmul.f32 1.442695, %v871_v37  ;;  %v872_v29 = vsub.f32 %v2588_v41, %v795_v7  ;;  %v873_v31 = vsub.f32 %v2592_v43, %v795_v7  ;;  %1067 = vadd.xlane.f32.xlu0 %v1066_v30 }
 0x33c   : > { %v1069_v60 = vadd.f32 %v2806_v42, %v2800_v3 }
 0x33d   : > { %1991 = vpow2.f32 %v966_v25  ;;  %v970_v39 = vmul.f32 1.442695, %v872_v29  ;;  %v972_v62 = vmul.f32 1.442695, %v873_v31 }
 0x33e   : > { %1993 = vpow2.f32 %v968_v28  ;;  %1070 = vadd.xlane.f32.xlu1 %v1069_v60 }
 0x33f   : > { %v2812_v40 = vpop.eup %1983  ;;  %1995 = vpow2.f32 %v970_v39 }
 0x340   : > { %v2814_v19 = vpop.eup %1985  ;;  %1997 = vpow2.f32 %v972_v62  ;;  %v798_v11 = vpop.xlane.xlu0 %797 }
 0x341   : > { %v2816_v20 = vpop.eup %1987  ;;  %v874_v41 = vsub.f32 %v2601_v46, %v798_v11  ;;  %v875_v43 = vsub.f32 %v2603_v47, %v798_v11  ;;  %v1072_v21 = vadd.f32 %v2814_v19, %v2812_v40 }
 0x342   : > { %v2822_v23 = vpop.eup %1989  ;;  %v801_v16 = vpop.xlane.xlu1 %800 }
 0x343   : > { %v974_v33 = vmul.f32 1.442695, %v874_v41  ;;  %v976_v26 = vmul.f32 1.442695, %v875_v43  ;;  %v876_v13 = vsub.f32 %v2605_v48, %v801_v16  ;;  %v877_v35 = vsub.f32 %v2609_v50, %v801_v16  ;;  %1073 = vadd.xlane.f32.xlu0 %v1072_v21 }
 0x344   : > { %v1075_v37 = vadd.f32 %v2822_v23, %v2816_v20 }
 0x345   : > { %1999 = vpow2.f32 %v974_v33  ;;  %v978_v46 = vmul.f32 1.442695, %v876_v13  ;;  %v980_v30 = vmul.f32 1.442695, %v877_v35 }
 0x346   : > { %2001 = vpow2.f32 %v976_v26  ;;  %1076 = vadd.xlane.f32.xlu1 %v1075_v37 }
 0x347   : > { %v2828_v47 = vpop.eup %1991  ;;  %2003 = vpow2.f32 %v978_v46 }
 0x348   : > { %v2830_v7 = vpop.eup %1993  ;;  %2005 = vpow2.f32 %v980_v30  ;;  %v804_v25 = vpop.xlane.xlu0 %803 }
 0x349   : > { %v2832_v28 = vpop.eup %1995  ;;  %v878_v48 = vsub.f32 %v2613_v55, %v804_v25  ;;  %v879_v50 = vsub.f32 %v2615_v57, %v804_v25  ;;  %v1078_v29 = vadd.f32 %v2830_v7, %v2828_v47 }
 0x34a   : > { %v2838_v31 = vpop.eup %1997  ;;  %v807_v60 = vpop.xlane.xlu1 %806 }
 0x34b   : > { %v982_v39 = vmul.f32 1.442695, %v878_v48  ;;  %v984_v62 = vmul.f32 1.442695, %v879_v50  ;;  %v880_v11 = vsub.f32 %v2617_v0, %v807_v60  ;;  %v881_v41 = vsub.f32 %v2621_v63, %v807_v60  ;;  %1079 = vadd.xlane.f32.xlu0 %v1078_v29  ;;  %v3256_v48 = vld [vmem:[#allocation17_spill] sm:$0xff] }
 0x34c   : > { %v1081_v43 = vadd.f32 %v2838_v31, %v2832_v28 }
 0x34d   : > { %2007 = vpow2.f32 %v982_v39  ;;  %v986_v55 = vmul.f32 1.442695, %v880_v11  ;;  %v988_v21 = vmul.f32 1.442695, %v881_v41 }
 0x34e   : > { %2009 = vpow2.f32 %v984_v62  ;;  %1082 = vadd.xlane.f32.xlu1 %v1081_v43  ;;  %v3258_v43 = vld [vmem:[#allocation19_spill] sm:$0xff] }
 0x34f   : > { %v2844_v57 = vpop.eup %1999  ;;  %2011 = vpow2.f32 %v986_v55 }
 0x350   : > { %v2846_v16 = vpop.eup %2001  ;;  %2013 = vpow2.f32 %v988_v21  ;;  %v810_v33 = vpop.xlane.xlu0 %809 }
 0x351   : > { %v2848_v26 = vpop.eup %2003  ;;  %v882_v0 = vsub.f32 %v2625_v6, %v810_v33  ;;  %v883_v63 = vsub.f32 %v2627_v10, %v810_v33  ;;  %v1084_v13 = vadd.f32 %v2846_v16, %v2844_v57 }
 0x352   : > { %v2854_v35 = vpop.eup %2005  ;;  %v813_v37 = vpop.xlane.xlu1 %812 }
 0x353   : > { %v990_v46 = vmul.f32 1.442695, %v882_v0  ;;  %v992_v30 = vmul.f32 1.442695, %v883_v63  ;;  %v884_v25 = vsub.f32 %v2629_v12, %v813_v37  ;;  %v885_v50 = vsub.f32 %v3256_v48, %v813_v37  ;;  %1085 = vadd.xlane.f32.xlu0 %v1084_v13  ;;  %v3257_v12 = vld [vmem:[#allocation18_spill] sm:$0xff]  ;;  %v3260_v37 = vld [vmem:[#allocation20_spill] sm:$0xff] }
 0x354   : > { %v1087_v29 = vadd.f32 %v2854_v35, %v2848_v26 }
 0x355   : > { %2015 = vpow2.f32 %v990_v46  ;;  %v994_v6 = vmul.f32 1.442695, %v884_v25  ;;  %v996_v60 = vmul.f32 1.442695, %v885_v50 }
 0x356   : > { %2017 = vpow2.f32 %v992_v30  ;;  %1088 = vadd.xlane.f32.xlu1 %v1087_v29  ;;  %v3261_v30 = vld [vmem:[#allocation21_spill] sm:$0xff] }
 0x357   : > { %v2860_v10 = vpop.eup %2007  ;;  %2019 = vpow2.f32 %v994_v6 }
 0x358   : > { %v2862_v39 = vpop.eup %2009  ;;  %2021 = vpow2.f32 %v996_v60  ;;  %v816_v62 = vpop.xlane.xlu0 %815 }
 0x359   : > { %v2864_v11 = vpop.eup %2011  ;;  %v886_v41 = vsub.f32 %v3257_v12, %v816_v62  ;;  %v887_v55 = vsub.f32 %v3258_v43, %v816_v62  ;;  %v1090_v21 = vadd.f32 %v2862_v39, %v2860_v10 }
 0x35a   : > { %v2870_v33 = vpop.eup %2013  ;;  %v819_v0 = vpop.xlane.xlu1 %818 }
 0x35b   : > { %3259 = vst [vmem:[#allocation17_spill] sm:$0xff] %v2870_v33  ;;  %v998_v63 = vmul.f32 1.442695, %v886_v41  ;;  %v1000_v13 = vmul.f32 1.442695, %v887_v55  ;;  %v888_v46 = vsub.f32 %v3260_v37, %v819_v0  ;;  %v889_v25 = vsub.f32 %v3261_v30, %v819_v0  ;;  %1091 = vadd.xlane.f32.xlu0 %v1090_v21  ;;  %v3265_v41 = vld [vmem:[#allocation22_spill] sm:$0xff] }
 0x35c   : > { %v1093_v48 = vadd.f32 %v2870_v33, %v2864_v11  ;;  %v3266_v55 = vld [vmem:[#allocation23_spill] sm:$0xff] }
 0x35d   : > { %2023 = vpow2.f32 %v998_v63  ;;  %v1002_v50 = vmul.f32 1.442695, %v888_v46  ;;  %v1004_v29 = vmul.f32 1.442695, %v889_v25 }
 0x35e   : > { %2025 = vpow2.f32 %v1000_v13  ;;  %1094 = vadd.xlane.f32.xlu1 %v1093_v48 }
 0x35f   : > { %v2876_v6 = vpop.eup %2015  ;;  %2027 = vpow2.f32 %v1002_v50 }
 0x360   : > { %3262 = vst [vmem:[#allocation18_spill] sm:$0xff] %v2876_v6  ;;  %v2878_v60 = vpop.eup %2017  ;;  %2029 = vpow2.f32 %v1004_v29  ;;  %v822_v62 = vpop.xlane.xlu0 %821 }
 0x361   : > { %3263 = vst [vmem:[#allocation19_spill] sm:$0xff] %v2878_v60  ;;  %v2880_v12 = vpop.eup %2019  ;;  %v890_v43 = vsub.f32 %v3265_v41, %v822_v62  ;;  %v891_v21 = vsub.f32 %v3266_v55, %v822_v62  ;;  %v1096_v0 = vadd.f32 %v2878_v60, %v2876_v6 }
 0x362   : > { %3264 = vst [vmem:[#allocation20_spill] sm:$0xff] %v2880_v12  ;;  %v2886_v63 = vpop.eup %2021 }
 0x363   : > { %3267 = vst [vmem:[#allocation21_spill] sm:$0xff] %v2886_v63  ;;  %v1006_v13 = vmul.f32 1.442695, %v890_v43  ;;  %v1008_v37 = vmul.f32 1.442695, %v891_v21  ;;  %1097 = vadd.xlane.f32.xlu0 %v1096_v0  ;;  %v1099_v46 = vadd.f32 %v2886_v63, %v2880_v12  ;;  %v298_v21 = vld [vmem:[%s3199_s2 + $0x10] sm:$0xff] }
 0x364   : > { %v2911_v0 = vpop.f32.mrb[4].mxu0 }
 0x365   : > { %2031 = vpow2.f32 %v1006_v13  ;;  %1100 = vadd.xlane.f32.xlu1 %v1099_v46  ;;  %3274 = vst [vmem:[#allocation36_spill] sm:$0xff] %v2911_v0  ;;  %v2913_v13 = vpop.f32.mrb[5].mxu0  ;;  %v825_v46 = vpop.xlane.xlu1 %824 }
 0x366   : > { %2033 = vpow2.f32 %v1008_v37  ;;  %3275 = vst [vmem:[#allocation37_spill] sm:$0xff] %v2913_v13  ;;  %v297_v37 = vld [vmem:[%s3199_s2 + $0x8] sm:$0xff] }
 0x367   : > { %v2890_v30 = vpop.eup %2023 }
 0x368   : > { %3268 = vst [vmem:[#allocation22_spill] sm:$0xff] %v2890_v30  ;;  %v2892_v25 = vpop.eup %2025 }
 0x369   : > { %3269 = vst [vmem:[#allocation23_spill] sm:$0xff] %v2892_v25  ;;  %v2894_v48 = vpop.eup %2027  ;;  %v1102_v50 = vadd.f32 %v2892_v25, %v2890_v30 }
 0x36a   : > { %3270 = vst [vmem:[#allocation32_spill] sm:$0xff] %v2894_v48  ;;  %v2898_v29 = vpop.eup %2029 }
 0x36b   : > { %3271 = vst [vmem:[#allocation33_spill] sm:$0xff] %v2898_v29  ;;  %1103 = vadd.xlane.f32.xlu0 %v1102_v50  ;;  %v1105_v62 = vadd.f32 %v2898_v29, %v2894_v48  ;;  %v3276_v50 = vld [vmem:[#allocation24_spill] sm:$0xff]  ;;  %v3277_v29 = vld [vmem:[#allocation25_spill] sm:$0xff] }
 0x36c   : > { %v3278_v48 = vld [vmem:[#allocation28_spill] sm:$0xff] }
 0x36d   : > { %1106 = vadd.xlane.f32.xlu1 %v1105_v62  ;;  %v892_v62 = vsub.f32 %v3276_v50, %v825_v46 }
 0x36f   : > { %v2902_v41 = vpop.eup %2031 }
 0x370   : > { %3272 = vst [vmem:[#allocation34_spill] sm:$0xff] %v2902_v41  ;;  %v2904_v43 = vpop.eup %2033 }
 0x371   : > { %3273 = vst [vmem:[#allocation35_spill] sm:$0xff] %v2904_v43  ;;  %v1108_v55 = vadd.f32 %v2904_v43, %v2902_v41  ;;  %v893_v43 = vsub.f32 %v3277_v29, %v825_v46  ;;  %v1010_v41 = vmul.f32 1.442695, %v892_v62  ;;  %v3280_v62 = vld [vmem:[#allocation26_spill] sm:$0xff] }
 0x373   : > { %1109 = vadd.xlane.f32.xlu0 %v1108_v55  ;;  %v831_v55 = vpop.xlane.xlu1 %830  ;;  %v1012_v30 = vmul.f32 1.442695, %v893_v43  ;;  %2035 = vpow2.f32 %v1010_v41  ;;  %v3281_v43 = vld [vmem:[#allocation27_spill] sm:$0xff] }
 0x374   : > { %v896_v25 = vsub.f32 %v3278_v48, %v831_v55 }
 0x375   : > { %2037 = vpow2.f32 %v1012_v30 }
 0x376   : > { %v1018_v12 = vmul.f32 1.442695, %v896_v25 }
 0x378   : > { %2039 = vpow2.f32 %v1018_v12 }
 0x37d   : > { %v2922_v50 = vpop.eup %2035 }
 0x37e   : > { %313 = vperm.xlu1 %1923, %v298_v21   ;;  %v3279_v21 = vld [vmem:[#allocation29_spill] sm:$0xff] }
 0x37f   : > { %v897_v63 = vsub.f32 %v3279_v21, %v831_v55  ;;  %v2924_v46 = vpop.eup %2037 }
 0x380   : > { %v1111_v60 = vadd.f32 %v2924_v46, %v2922_v50 }
 0x381   : > { %v1020_v13 = vmul.f32 1.442695, %v897_v63  ;;  %v3282_v63 = vld [vmem:[#allocation30_spill] sm:$0xff] }
 0x383   : > { %2041 = vpow2.f32 %v1020_v13  ;;  %v3283_v13 = vld [vmem:[#allocation31_spill] sm:$0xff] }
 0x389   : > { %308 = vperm.xlu0 %1922, %v297_v37  }
 0x398   : > { %v1032_v0 = vpop.xlane.xlu0 %1031 }
 0x399   : > { %2043 = vrcp.f32 %v1032_v0  ;;  %v2930_v0 = vpop.eup %2039 }
 0x39a   : > { %v1035_v37 = vpop.xlane.xlu1 %1034  ;;  %3284 = vst [vmem:[#allocation24_spill] sm:$0xff] %v2930_v0  ;;  %v2934_v6 = vpop.eup %2041 }
 0x39b   : > { %2045 = vrcp.f32 %v1035_v37  ;;  %3285 = vst [vmem:[#allocation25_spill] sm:$0xff] %v2934_v6 }
 0x39c   : > { %v828_v29 = vpop.xlane.xlu0 %827 }
 0x39d   : > { %v894_v48 = vsub.f32 %v3280_v62, %v828_v29  ;;  %v895_v55 = vsub.f32 %v3281_v43, %v828_v29 }
 0x39e   : > { %v837_v41 = vpop.xlane.xlu1 %836 }
 0x39f   : > { %v1014_v25 = vmul.f32 1.442695, %v894_v48  ;;  %v1016_v30 = vmul.f32 1.442695, %v895_v55  ;;  %v900_v12 = vsub.f32 %v3282_v63, %v837_v41  ;;  %v901_v21 = vsub.f32 %v3283_v13, %v837_v41 }
 0x3a0   : > { %v1038_v37 = vpop.xlane.xlu0 %1037  ;;  %v1117_v55 = vadd.f32 %v2934_v6, %v2930_v0 }
 0x3a1   : > { %2047 = vpow2.f32 %v1014_v25  ;;  %v1026_v62 = vmul.f32 1.442695, %v900_v12  ;;  %v1028_v33 = vmul.f32 1.442695, %v901_v21 }
 0x3a2   : > { %2049 = vpow2.f32 %v1016_v30  ;;  %1112 = vadd.xlane.f32.xlu1 %v1111_v60 }
 0x3a3   : > { %v2044_v29 = vpop.eup %2043  ;;  %2051 = vpow2.f32 %v1026_v62 }
 0x3a4   : > { %2053 = vpow2.f32 %v1028_v33  ;;  %v834_v48 = vpop.xlane.xlu0 %833  ;;  %v1041_v43 = vpop.xlane.xlu1 %1040  ;;  %v1158_v41 = vmul.f32 %v2044_v29, %v2697_v56  ;;  %v1159_v63 = vmul.f32 %v2044_v29, %v2699_v38 }
 0x3a5   : > { %v2046_v13 = vpop.eup %2045  ;;  %2055 = vrcp.f32 %v1038_v37  ;;  %v898_v25 = vsub.f32 %v2673_v51, %v834_v48  ;;  %v899_v30 = vsub.f32 %v2675_v45, %v834_v48 }
 0x3a6   : > { %2057 = vrcp.f32 %v1041_v43  ;;  %1118 = vadd.xlane.f32.xlu1 %v1117_v55  ;;  %v1160_v60 = vmul.f32 %v2046_v13, %v2701_v49  ;;  %v1161_v33 = vmul.f32 %v2046_v13, %v2707_v18  ;;  %v1781_v12 = vpack.c.bf16 %v1159_v63, %v1158_v41 }
 0x3a7   : > { %v1022_v21 = vmul.f32 1.442695, %v898_v25  ;;  %v1024_v62 = vmul.f32 1.442695, %v899_v30 }
 0x3a8   : > { %v1044_v6 = vpop.xlane.xlu0 %1043  ;;  %v1223_v0 = vpack.c.bf16 %v1161_v33, %v1159_v63  ;;  %v1782_v56 = vpack.c.bf16 %v1161_v33, %v1160_v60  ;;  %1414 = vst [vmem:[%s2945_s6] sm:$0xff] %v1781_v12  ;;  %v1222_v51 = vpack.c.bf16 %v1160_v60, %v1158_v41 }
 0x3a9   : > { %2059 = vpow2.f32 %v1022_v21 }
 0x3aa   : > { %2061 = vpow2.f32 %v1024_v62  ;;  %1415 = vst [vmem:[%s2945_s6 + $0x8] sm:$0xff] %v1782_v56  ;;  %1450 = vmatprep.subr.bf16.mxu0 %v1223_v0  ;;  %1815 = vmatprep.subr.bf16.mxu1 %v1223_v0 }
 0x3ab   : > { %v2949_v45 = vpop.eup %2047  ;;  %2063 = vrcp.f32 %v1044_v6  ;;  %1451 = vmatpush1.bf16.xpose.msra.mxu0 %v1222_v51  ;;  %1831 = vmatpush1.bf16.xpose.msra.mxu1 %v1222_v51 }
 0x3ac   : > { %v2951_v38 = vpop.eup %2049  ;;  %v1047_v49 = vpop.xlane.xlu1 %1046 }
 0x3ad   : > { %v2953_v18 = vpop.eup %2051  ;;  %2065 = vrcp.f32 %v1047_v49  ;;  %v1114_v37 = vadd.f32 %v2951_v38, %v2949_v45 }
 0x3ae   : > { %v2957_v29 = vpop.eup %2053 }
 0x3af   : > { %v2056_v48 = vpop.eup %2055  ;;  %1115 = vadd.xlane.f32.xlu0 %v1114_v37  ;;  %v1123_v0 = vadd.f32 %v2957_v29, %v2953_v18 }
 0x3b0   : > { %v2058_v6 = vpop.eup %2057  ;;  %v1050_v43 = vpop.xlane.xlu0 %1049  ;;  %v1162_v55 = vmul.f32 %v2056_v48, %v2713_v2  ;;  %v1163_v41 = vmul.f32 %v2056_v48, %v2715_v53 }
 0x3b1   : > { %2067 = vrcp.f32 %v1050_v43  ;;  %1124 = vadd.xlane.f32.xlu1 %v1123_v0  ;;  %v1164_v63 = vmul.f32 %v2058_v6, %v2721_v5  ;;  %v1165_v13 = vmul.f32 %v2058_v6, %v2723_v44 }
 0x3b2   : > { %v1783_v25 = vpack.c.bf16 %v1163_v41, %v1162_v55 }
 0x3b3   : > { %v2965_v30 = vpop.eup %2059  ;;  %v1225_v60 = vpack.c.bf16 %v1165_v13, %v1163_v41  ;;  %v1784_v33 = vpack.c.bf16 %v1165_v13, %v1164_v63  ;;  %v1224_v12 = vpack.c.bf16 %v1164_v63, %v1162_v55  ;;  %v299_v63 = vld [vmem:[%s3199_s2 + $0x18] sm:$0xff]  ;;  %v2984_v13 = vpop.f32.mrb[6].mxu0 }
 0x3b4   : > { %v2967_v21 = vpop.eup %2061  ;;  %1416 = vst [vmem:[%s2945_s6 + $0x10] sm:$0xff] %v1783_v25  ;;  %v1053_v62 = vpop.xlane.xlu1 %1052 }
 0x3b5   : > { %v2064_v56 = vpop.eup %2063  ;;  %1417 = vst [vmem:[%s2945_s6 + $0x18] sm:$0xff] %v1784_v33  ;;  %1452 = vmatprep.subr.bf16.mxu0 %v1225_v60  ;;  %1816 = vmatprep.subr.bf16.mxu1 %v1225_v60  ;;  %2069 = vrcp.f32 %v1053_v62  ;;  %v1120_v2 = vadd.f32 %v2967_v21, %v2965_v30 }
 0x3b6   : > { %1453 = vmatpush1.bf16.xpose.msra.mxu0 %v1224_v12  ;;  %1832 = vmatpush1.bf16.xpose.msra.mxu1 %v1224_v12  ;;  %v1166_v53 = vmul.f32 %v2064_v56, %v2729_v22  ;;  %v1167_v5 = vmul.f32 %v2064_v56, %v2734_v24 }
 0x3b7   : > { %v2066_v44 = vpop.eup %2065  ;;  %1121 = vadd.xlane.f32.xlu0 %v1120_v2 }
 0x3b8   : > { %v1056_v51 = vpop.xlane.xlu0 %1055  ;;  %v1168_v49 = vmul.f32 %v2066_v44, %v2740_v4  ;;  %v1169_v37 = vmul.f32 %v2066_v44, %v2742_v52  ;;  %v1785_v48 = vpack.c.bf16 %v1167_v5, %v1166_v53 }
 0x3b9   : > { %2071 = vrcp.f32 %v1056_v51 }
 0x3ba   : > { %v1227_v0 = vpack.c.bf16 %v1169_v37, %v1167_v5  ;;  %v1786_v6 = vpack.c.bf16 %v1169_v37, %v1168_v49  ;;  %1418 = vst [vmem:[%s2945_s6 + $0x20] sm:$0xff] %v1785_v48  ;;  %v1226_v43 = vpack.c.bf16 %v1168_v49, %v1166_v53 }
 0x3bb   : > { %v2068_v55 = vpop.eup %2067 }
 0x3bc   : > { %1419 = vst [vmem:[%s2945_s6 + $0x28] sm:$0xff] %v1786_v6  ;;  %1454 = vmatprep.subr.bf16.mxu0 %v1227_v0  ;;  %1817 = vmatprep.subr.bf16.mxu1 %v1227_v0  ;;  %v1059_v22 = vpop.xlane.xlu1 %1058  ;;  %v1170_v24 = vmul.f32 %v2068_v55, %v2748_v14  ;;  %v1171_v41 = vmul.f32 %v2068_v55, %v2750_v32  ;;  %v2989_v14 = vpop.f32.mrb[7].mxu0 }
 0x3bd   : > { %2073 = vrcp.f32 %v1059_v22  ;;  %v2997_v37 = vpop.f32.mrb[8].mxu0 }
 0x3be   : > { %1455 = vmatpush1.bf16.xpose.msra.mxu0 %v1226_v43  ;;  %1833 = vmatpush1.bf16.xpose.msra.mxu1 %v1226_v43  ;;  %v1787_v4 = vpack.c.bf16 %v1171_v41, %v1170_v24  ;;  %v2999_v48 = vpop.f32.mrb[9].mxu0 }
 0x3bf   : > { %v2070_v52 = vpop.eup %2069  ;;  %v407_v43 = vpop.f32.mrb[10].mxu0 }
 0x3c0   : > { %v1062_v25 = vpop.xlane.xlu0 %1061  ;;  %v1172_v60 = vmul.f32 %v2070_v52, %v2756_v8  ;;  %v1173_v33 = vmul.f32 %v2070_v52, %v2760_v9  ;;  %1420 = vst [vmem:[%s2945_s6 + $0x30] sm:$0xff] %v1787_v4 }
 0x3c1   : > { %2075 = vrcp.f32 %v1062_v25 }
 0x3c2   : > { %318 = vperm.xlu1 %1923, %v299_v63   ;;  %v1229_v32 = vpack.c.bf16 %v1173_v33, %v1171_v41  ;;  %v1788_v12 = vpack.c.bf16 %v1173_v33, %v1172_v60  ;;  %v1228_v62 = vpack.c.bf16 %v1172_v60, %v1170_v24 }
 0x3c3   : > { %v2072_v56 = vpop.eup %2071  ;;  %v1065_v2 = vpop.xlane.xlu1 %1064 }
 0x3c4   : > { %2077 = vrcp.f32 %v1065_v2  ;;  %1421 = vst [vmem:[%s2945_s6 + $0x38] sm:$0xff] %v1788_v12  ;;  %1456 = vmatprep.subr.bf16.mxu0 %v1229_v32  ;;  %1818 = vmatprep.subr.bf16.mxu1 %v1229_v32  ;;  %v1174_v53 = vmul.f32 %v2072_v56, %v2764_v36  ;;  %v1175_v8 = vmul.f32 %v2072_v56, %v2766_v1  ;;  %v300_v36 = vld [vmem:[%s3199_s2 + $0x20] sm:$0xff] }
 0x3c6   : > { %1457 = vmatpush1.bf16.xpose.msra.mxu0 %v1228_v62  ;;  %1834 = vmatpush1.bf16.xpose.msra.mxu1 %v1228_v62  ;;  %v1789_v9 = vpack.c.bf16 %v1175_v8, %v1174_v53 }
 0x3c7   : > { %v2074_v5 = vpop.eup %2073 }
 0x3c8   : > { %v1068_v44 = vpop.xlane.xlu0 %1067  ;;  %v1176_v51 = vmul.f32 %v2074_v5, %v2772_v54  ;;  %v1177_v49 = vmul.f32 %v2074_v5, %v2776_v58  ;;  %1422 = vst [vmem:[%s2945_s6 + $0x40] sm:$0xff] %v1789_v9  ;;  %v408_v54 = vpop.f32.mrb[11].mxu0 }
 0x3c9   : > { %2079 = vrcp.f32 %v1068_v44 }
 0x3ca   : > { %v1231_v1 = vpack.c.bf16 %v1177_v49, %v1175_v8  ;;  %v1790_v0 = vpack.c.bf16 %v1177_v49, %v1176_v51  ;;  %v1230_v6 = vpack.c.bf16 %v1176_v51, %v1174_v53 }
 0x3cb   : > { %v2076_v55 = vpop.eup %2075  ;;  %v1071_v22 = vpop.xlane.xlu1 %1070 }
 0x3cc   : > { %2081 = vrcp.f32 %v1071_v22  ;;  %1423 = vst [vmem:[%s2945_s6 + $0x48] sm:$0xff] %v1790_v0  ;;  %1458 = vmatprep.subr.bf16.mxu0 %v1231_v1  ;;  %1819 = vmatprep.subr.bf16.mxu1 %v1231_v1  ;;  %v1178_v58 = vmul.f32 %v2076_v55, %v2780_v15  ;;  %v1179_v24 = vmul.f32 %v2076_v55, %v2782_v17 }
 0x3cd   : > { %323 = vperm.xlu0 %1922, %v300_v36  }
 0x3ce   : > { %v2078_v41 = vpop.eup %2077  ;;  %1459 = vmatpush1.bf16.xpose.msra.mxu0 %v1230_v6  ;;  %1835 = vmatpush1.bf16.xpose.msra.mxu1 %v1230_v6  ;;  %v1791_v4 = vpack.c.bf16 %v1179_v24, %v1178_v58 }
 0x3cf   : > { %v1180_v52 = vmul.f32 %v2078_v41, %v2784_v59  ;;  %v1181_v63 = vmul.f32 %v2078_v41, %v2790_v61 }
 0x3d0   : > { %v1074_v25 = vpop.xlane.xlu0 %1073  ;;  %1424 = vst [vmem:[%s2945_s6 + $0x50] sm:$0xff] %v1791_v4 }
 0x3d1   : > { %2083 = vrcp.f32 %v1074_v25  ;;  %v1233_v60 = vpack.c.bf16 %v1181_v63, %v1179_v24  ;;  %v1792_v33 = vpack.c.bf16 %v1181_v63, %v1180_v52  ;;  %v1232_v17 = vpack.c.bf16 %v1180_v52, %v1178_v58 }
 0x3d3   : > { %v2080_v32 = vpop.eup %2079  ;;  %1425 = vst [vmem:[%s2945_s6 + $0x58] sm:$0xff] %v1792_v33  ;;  %1460 = vmatprep.subr.bf16.mxu0 %v1233_v60  ;;  %1820 = vmatprep.subr.bf16.mxu1 %v1233_v60  ;;  %v1077_v15 = vpop.xlane.xlu1 %1076 }
 0x3d4   : > { %2085 = vrcp.f32 %v1077_v15  ;;  %v1182_v12 = vmul.f32 %v2080_v32, %v2796_v34  ;;  %v1183_v59 = vmul.f32 %v2080_v32, %v2798_v27 }
 0x3d6   : > { %v2082_v62 = vpop.eup %2081  ;;  %1461 = vmatpush1.bf16.xpose.msra.mxu0 %v1232_v17  ;;  %1836 = vmatpush1.bf16.xpose.msra.mxu1 %v1232_v17  ;;  %v1793_v61 = vpack.c.bf16 %v1183_v59, %v1182_v12 }
 0x3d7   : > { %v1184_v56 = vmul.f32 %v2082_v62, %v2800_v3  ;;  %v1185_v2 = vmul.f32 %v2082_v62, %v2806_v42 }
 0x3d8   : > { %v1080_v53 = vpop.xlane.xlu0 %1079  ;;  %1426 = vst [vmem:[%s2945_s6 + $0x60] sm:$0xff] %v1793_v61 }
 0x3d9   : > { %2087 = vrcp.f32 %v1080_v53  ;;  %v1235_v8 = vpack.c.bf16 %v1185_v2, %v1183_v59  ;;  %v1794_v9 = vpack.c.bf16 %v1185_v2, %v1184_v56  ;;  %v1234_v27 = vpack.c.bf16 %v1184_v56, %v1182_v12  ;;  %v3286_v56 = vld [vmem:[#allocation17_spill] sm:$0xff] }
 0x3db   : > { %v2084_v5 = vpop.eup %2083  ;;  %1427 = vst [vmem:[%s2945_s6 + $0x68] sm:$0xff] %v1794_v9  ;;  %1462 = vmatprep.subr.bf16.mxu0 %v1235_v8  ;;  %1821 = vmatprep.subr.bf16.mxu1 %v1235_v8  ;;  %v1083_v34 = vpop.xlane.xlu1 %1082 }
 0x3dc   : > { %2089 = vrcp.f32 %v1083_v34  ;;  %v1186_v44 = vmul.f32 %v2084_v5, %v2812_v40  ;;  %v1187_v3 = vmul.f32 %v2084_v5, %v2814_v19 }
 0x3de   : > { %v2086_v51 = vpop.eup %2085  ;;  %1463 = vmatpush1.bf16.xpose.msra.mxu0 %v1234_v27  ;;  %1837 = vmatpush1.bf16.xpose.msra.mxu1 %v1234_v27  ;;  %v1795_v42 = vpack.c.bf16 %v1187_v3, %v1186_v44 }
 0x3df   : > { %v1188_v49 = vmul.f32 %v2086_v51, %v2816_v20  ;;  %v1189_v36 = vmul.f32 %v2086_v51, %v2822_v23 }
 0x3e0   : > { %v1086_v1 = vpop.xlane.xlu0 %1085  ;;  %1428 = vst [vmem:[%s2945_s6 + $0x70] sm:$0xff] %v1795_v42 }
 0x3e1   : > { %2091 = vrcp.f32 %v1086_v1  ;;  %v1237_v0 = vpack.c.bf16 %v1189_v36, %v1187_v3  ;;  %v1796_v6 = vpack.c.bf16 %v1189_v36, %v1188_v49  ;;  %v1236_v19 = vpack.c.bf16 %v1188_v49, %v1186_v44  ;;  %v3288_v44 = vld [vmem:[#allocation19_spill] sm:$0xff]  ;;  %v3289_v49 = vld [vmem:[#allocation36_spill] sm:$0xff] }
 0x3e2   : > { %v3290_v1 = vld [vmem:[#allocation20_spill] sm:$0xff] }
 0x3e3   : > { %v2088_v43 = vpop.eup %2087  ;;  %1429 = vst [vmem:[%s2945_s6 + $0x78] sm:$0xff] %v1796_v6  ;;  %1464 = vmatprep.subr.bf16.mxu0 %v1237_v0  ;;  %1822 = vmatprep.subr.bf16.mxu1 %v1237_v0  ;;  %v1089_v40 = vpop.xlane.xlu1 %1088  ;;  %v3291_v6 = vld [vmem:[#allocation21_spill] sm:$0xff] }
 0x3e4   : > { %2093 = vrcp.f32 %v1089_v40  ;;  %v1190_v55 = vmul.f32 %v2088_v43, %v2828_v47  ;;  %v1191_v20 = vmul.f32 %v2088_v43, %v2830_v7 }
 0x3e6   : > { %v2090_v22 = vpop.eup %2089  ;;  %1465 = vmatpush1.bf16.xpose.msra.mxu0 %v1236_v19  ;;  %1838 = vmatpush1.bf16.xpose.msra.mxu1 %v1236_v19  ;;  %v1797_v23 = vpack.c.bf16 %v1191_v20, %v1190_v55 }
 0x3e7   : > { %v1192_v54 = vmul.f32 %v2090_v22, %v2832_v28  ;;  %v1193_v58 = vmul.f32 %v2090_v22, %v2838_v31 }
 0x3e8   : > { %v1092_v24 = vpop.xlane.xlu0 %1091  ;;  %1430 = vst [vmem:[%s2945_s6 + $0x80] sm:$0xff] %v1797_v23  ;;  %v3292_v23 = vld [vmem:[#allocation22_spill] sm:$0xff] }
 0x3e9   : > { %2095 = vrcp.f32 %v1092_v24  ;;  %v1239_v41 = vpack.c.bf16 %v1193_v58, %v1191_v20  ;;  %v1798_v4 = vpack.c.bf16 %v1193_v58, %v1192_v54  ;;  %v1238_v7 = vpack.c.bf16 %v1192_v54, %v1190_v55  ;;  %v3293_v58 = vld [vmem:[#allocation23_spill] sm:$0xff] }
 0x3eb   : > { %v2092_v52 = vpop.eup %2091  ;;  %1431 = vst [vmem:[%s2945_s6 + $0x88] sm:$0xff] %v1798_v4  ;;  %1466 = vmatprep.subr.bf16.mxu0 %v1239_v41  ;;  %1823 = vmatprep.subr.bf16.mxu1 %v1239_v41  ;;  %v1095_v47 = vpop.xlane.xlu1 %1094  ;;  %v3294_v4 = vld [vmem:[#allocation32_spill] sm:$0xff] }
 0x3ec   : > { %2097 = vrcp.f32 %v1095_v47  ;;  %v1194_v63 = vmul.f32 %v2092_v52, %v2844_v57  ;;  %v1195_v28 = vmul.f32 %v2092_v52, %v2846_v16  ;;  %v3295_v47 = vld [vmem:[#allocation33_spill] sm:$0xff] }
 0x3ee   : > { %v2094_v25 = vpop.eup %2093  ;;  %1467 = vmatpush1.bf16.xpose.msra.mxu0 %v1238_v7  ;;  %1839 = vmatpush1.bf16.xpose.msra.mxu1 %v1238_v7  ;;  %v1799_v31 = vpack.c.bf16 %v1195_v28, %v1194_v63 }
 0x3ef   : > { %v1196_v60 = vmul.f32 %v2094_v25, %v2848_v26  ;;  %v1197_v33 = vmul.f32 %v2094_v25, %v2854_v35 }
 0x3f0   : > { %v1098_v32 = vpop.xlane.xlu0 %1097  ;;  %1432 = vst [vmem:[%s2945_s6 + $0x90] sm:$0xff] %v1799_v31 }
 0x3f1   : > { %2099 = vrcp.f32 %v1098_v32  ;;  %v1241_v15 = vpack.c.bf16 %v1197_v33, %v1195_v28  ;;  %v1800_v17 = vpack.c.bf16 %v1197_v33, %v1196_v60  ;;  %v1240_v16 = vpack.c.bf16 %v1196_v60, %v1194_v63  ;;  %v3296_v60 = vld [vmem:[#allocation37_spill] sm:$0xff]  ;;  %v3297_v32 = vld [vmem:[#allocation15_spill] sm:$0xff] }
 0x3f2   : > { %v1101_v57 = vpop.xlane.xlu1 %1100 }
 0x3f3   : > { %v2096_v12 = vpop.eup %2095  ;;  %1433 = vst [vmem:[%s2945_s6 + $0x98] sm:$0xff] %v1800_v17  ;;  %1468 = vmatprep.subr.bf16.mxu0 %v1241_v15  ;;  %1824 = vmatprep.subr.bf16.mxu1 %v1241_v15  ;;  %2101 = vrcp.f32 %v1101_v57  ;;  %v3298_v17 = vld [vmem:[#allocation16_spill] sm:$0xff] }
 0x3f4   : > { %v1198_v59 = vmul.f32 %v2096_v12, %v2860_v10  ;;  %v1199_v26 = vmul.f32 %v2096_v12, %v2862_v39  ;;  %v3287_v39 = vld [vmem:[#allocation18_spill] sm:$0xff] }
 0x3f6   : > { %v2098_v62 = vpop.eup %2097  ;;  %1469 = vmatpush1.bf16.xpose.msra.mxu0 %v1240_v16  ;;  %1840 = vmatpush1.bf16.xpose.msra.mxu1 %v1240_v16  ;;  %v1801_v35 = vpack.c.bf16 %v1199_v26, %v1198_v59 }
 0x3f7   : > { %v1200_v61 = vmul.f32 %v2098_v62, %v2864_v11  ;;  %v1201_v2 = vmul.f32 %v2098_v62, %v3286_v56  ;;  %v3299_v62 = vld [vmem:[#allocation34_spill] sm:$0xff] }
 0x3f8   : > { %v1104_v53 = vpop.xlane.xlu0 %1103  ;;  %1434 = vst [vmem:[%s2945_s6 + $0xa0] sm:$0xff] %v1801_v35 }
 0x3f9   : > { %2103 = vrcp.f32 %v1104_v53  ;;  %v1243_v8 = vpack.c.bf16 %v1201_v2, %v1199_v26  ;;  %v1802_v9 = vpack.c.bf16 %v1201_v2, %v1200_v61  ;;  %v1242_v10 = vpack.c.bf16 %v1200_v61, %v1198_v59  ;;  %v3300_v61 = vld [vmem:[#allocation35_spill] sm:$0xff] }
 0x3fa   : > { %v1107_v5 = vpop.xlane.xlu1 %1106 }
 0x3fb   : > { %v2100_v34 = vpop.eup %2099  ;;  %1435 = vst [vmem:[%s2945_s6 + $0xa8] sm:$0xff] %v1802_v9  ;;  %1470 = vmatprep.subr.bf16.mxu0 %v1243_v8  ;;  %1825 = vmatprep.subr.bf16.mxu1 %v1243_v8  ;;  %2105 = vrcp.f32 %v1107_v5 }
 0x3fc   : > { %v1202_v27 = vmul.f32 %v2100_v34, %v3287_v39  ;;  %v1203_v11 = vmul.f32 %v2100_v34, %v3288_v44 }
 0x3fd   : > { %v2102_v3 = vpop.eup %2101 }
 0x3fe   : > { %1471 = vmatpush1.bf16.xpose.msra.mxu0 %v1242_v10  ;;  %1841 = vmatpush1.bf16.xpose.msra.mxu1 %v1242_v10  ;;  %v314_v51 = vpop.permute.xlu1 %313  ;;  %v1803_v42 = vpack.c.bf16 %v1203_v11, %v1202_v27  ;;  %v1204_v0 = vmul.f32 %v2102_v3, %v3290_v1  ;;  %v1205_v43 = vmul.f32 %v2102_v3, %v3291_v6 }
 0x3ff   : > { %v3044_v36 = vadd.f32 %v3289_v49, %v314_v51  ;;  %v396_v33 = vadd.f32 %v3296_v60, %v314_v51  ;;  %v3301_v51 = vld [vmem:[#allocation24_spill] sm:$0xff]  ;;  %v3302_v49 = vld [vmem:[#allocation25_spill] sm:$0xff] }
 0x400   : > { %v1110_v40 = vpop.xlane.xlu0 %1109  ;;  %1436 = vst [vmem:[%s2945_s6 + $0xb0] sm:$0xff] %v1803_v42  ;;  %v1245_v19 = vpack.c.bf16 %v1205_v43, %v1203_v11  ;;  %v1804_v55 = vpack.c.bf16 %v1205_v43, %v1204_v0  ;;  %v1244_v22 = vpack.c.bf16 %v1204_v0, %v1202_v27 }
 0x401   : > { %2107 = vrcp.f32 %v1110_v40 }
 0x402   : > { %1437 = vst [vmem:[%s2945_s6 + $0xb8] sm:$0xff] %v1804_v55  ;;  %1472 = vmatprep.subr.bf16.mxu0 %v1245_v19  ;;  %1826 = vmatprep.subr.bf16.mxu1 %v1245_v19 }
 0x403   : > { %v2104_v20 = vpop.eup %2103 }
 0x404   : > { %v1206_v54 = vmul.f32 %v2104_v20, %v3292_v23  ;;  %v1207_v24 = vmul.f32 %v2104_v20, %v3293_v58 }
 0x405   : > { %v2106_v41 = vpop.eup %2105 }
 0x406   : > { %1473 = vmatpush1.bf16.xpose.msra.mxu0 %v1244_v22  ;;  %1842 = vmatpush1.bf16.xpose.msra.mxu1 %v1244_v22  ;;  %v1208_v52 = vmul.f32 %v2106_v41, %v3294_v4  ;;  %v1209_v7 = vmul.f32 %v2106_v41, %v3295_v47  ;;  %v1805_v63 = vpack.c.bf16 %v1207_v24, %v1206_v54 }
 0x408   : > { %v309_v28 = vpop.permute.xlu0 %308  ;;  %v1247_v25 = vpack.c.bf16 %v1209_v7, %v1207_v24  ;;  %v1806_v31 = vpack.c.bf16 %v1209_v7, %v1208_v52  ;;  %1438 = vst [vmem:[%s2945_s6 + $0xc0] sm:$0xff] %v1805_v63  ;;  %v1246_v26 = vpack.c.bf16 %v1208_v52, %v1206_v54 }
 0x409   : > { %v3057_v15 = vadd.f32 %v3297_v32, %v309_v28  ;;  %v390_v12 = vadd.f32 %v3298_v17, %v309_v28 }
 0x40a   : > { %1439 = vst [vmem:[%s2945_s6 + $0xc8] sm:$0xff] %v1806_v31  ;;  %1474 = vmatprep.subr.bf16.mxu0 %v1247_v25  ;;  %1827 = vmatprep.subr.bf16.mxu1 %v1247_v25 }
 0x40b   : > { %v2108_v57 = vpop.eup %2107  ;;  %v427_v16 = vpack.c.bf16 %v3044_v36, %v3057_v15  ;;  %v428_v59 = vpack.c.bf16 %v396_v33, %v390_v12 }
 0x40c   : > { %v1210_v35 = vmul.f32 %v2108_v57, %v3299_v62  ;;  %v1211_v56 = vmul.f32 %v2108_v57, %v3300_v61 }
 0x40d   : > { %1482 = vmatprep.mubr.bf16.mxu0 %v428_v59 }
 0x40e   : > { %1475 = vmatpush1.bf16.xpose.msra.mxu0 %v1246_v26  ;;  %1843 = vmatpush1.bf16.xpose.msra.mxu1 %v1246_v26  ;;  %v1807_v2 = vpack.c.bf16 %v1211_v56, %v1210_v35 }
 0x410   : > { %1440 = vst [vmem:[%s2945_s6 + $0xd0] sm:$0xff] %v1807_v2 }
 0x42f   : > { %v1113_v53 = vpop.xlane.xlu1 %1112 }
 0x430   : > { %2109 = vrcp.f32 %v1113_v53 }
 0x433   : > { %v1119_v8 = vpop.xlane.xlu1 %1118 }
 0x434   : > { %2111 = vrcp.f32 %v1119_v8 }
 0x43a   : > { %v2110_v9 = vpop.eup %2109 }
 0x43b   : > { %v1212_v5 = vmul.f32 %v2110_v9, %v2922_v50  ;;  %v1213_v34 = vmul.f32 %v2110_v9, %v2924_v46 }
 0x43c   : > { %v1116_v10 = vpop.xlane.xlu0 %1115 }
 0x43d   : > { %2113 = vrcp.f32 %v1116_v10  ;;  %v1249_v39 = vpack.c.bf16 %v1213_v34, %v1211_v56  ;;  %v1808_v27 = vpack.c.bf16 %v1213_v34, %v1212_v5  ;;  %v1248_v44 = vpack.c.bf16 %v1212_v5, %v1210_v35 }
 0x43e   : > { %v2112_v11 = vpop.eup %2111  ;;  %v1125_v3 = vpop.xlane.xlu1 %1124 }
 0x43f   : > { %2115 = vrcp.f32 %v1125_v3  ;;  %1441 = vst [vmem:[%s2945_s6 + $0xd8] sm:$0xff] %v1808_v27  ;;  %1476 = vmatprep.subr.bf16.mxu0 %v1249_v39  ;;  %1828 = vmatprep.subr.bf16.mxu1 %v1249_v39  ;;  %v1216_v42 = vmul.f32 %v2112_v11, %v3301_v51  ;;  %v1217_v1 = vmul.f32 %v2112_v11, %v3302_v49 }
 0x440   : > { %1477 = vmatpush1.bf16.xpose.msra.mxu0 %v1248_v44  ;;  %1844 = vmatpush1.bf16.xpose.msra.mxu1 %v1248_v44 }
 0x441   : > { %v1810_v50 = vpack.c.bf16 %v1217_v1, %v1216_v42 }
 0x442   : > { %v319_v19 = vpop.permute.xlu1 %318 }
 0x443   : > { %1443 = vst [vmem:[%s2945_s6 + $0xe8] sm:$0xff] %v1810_v50  ;;  %v398_v58 = vadd.f32 %v2984_v13, %v319_v19  ;;  %v400_v24 = vadd.f32 %v2989_v14, %v319_v19 }
 0x444   : > { %v1122_v46 = vpop.xlane.xlu0 %1121 }
 0x445   : > { %2117 = vrcp.f32 %v1122_v46 }
 0x447   : > { %v2114_v0 = vpop.eup %2113 }
 0x448   : > { %v1214_v6 = vmul.f32 %v2114_v0, %v2949_v45  ;;  %v1215_v43 = vmul.f32 %v2114_v0, %v2951_v38 }
 0x449   : > { %v2116_v40 = vpop.eup %2115 }
 0x44a   : > { %v1251_v55 = vpack.c.bf16 %v1217_v1, %v1215_v43  ;;  %v1809_v20 = vpack.c.bf16 %v1215_v43, %v1214_v6  ;;  %v1250_v22 = vpack.c.bf16 %v1216_v42, %v1214_v6  ;;  %v1220_v23 = vmul.f32 %v2116_v40, %v2953_v18 }
 0x44b   : > { %v1221_v54 = vmul.f32 %v2116_v40, %v2957_v29 }
 0x44c   : > { %v324_v41 = vpop.permute.xlu0 %323  ;;  %1442 = vst [vmem:[%s2945_s6 + $0xe0] sm:$0xff] %v1809_v20  ;;  %1478 = vmatprep.subr.bf16.mxu0 %v1251_v55  ;;  %1829 = vmatprep.subr.bf16.mxu1 %v1251_v55 }
 0x44d   : > { %v404_v45 = vadd.f32 %v2997_v37, %v324_v41  ;;  %v406_v38 = vadd.f32 %v2999_v48, %v324_v41  ;;  %1479 = vmatpush1.bf16.xpose.msra.mxu0 %v1250_v22  ;;  %1845 = vmatpush1.bf16.xpose.msra.mxu1 %v1250_v22  ;;  %v1812_v4 = vpack.c.bf16 %v1221_v54, %v1220_v23 }
 0x44f   : > { %v2118_v18 = vpop.eup %2117  ;;  %v429_v52 = vpack.c.bf16 %v404_v45, %v398_v58  ;;  %v430_v29 = vpack.c.bf16 %v406_v38, %v400_v24  ;;  %1445 = vst [vmem:[%s2945_s6 + $0xf8] sm:$0xff] %v1812_v4 }
 0x450   : > { %v1218_v13 = vmul.f32 %v2118_v18, %v2965_v30  ;;  %v1219_v14 = vmul.f32 %v2118_v18, %v2967_v21 }
 0x451   : > { %1492 = vmatprep.mubr.bf16.mxu1 %v430_v29 }
 0x452   : > { %v1253_v47 = vpack.c.bf16 %v1221_v54, %v1219_v14  ;;  %v1811_v7 = vpack.c.bf16 %v1219_v14, %v1218_v13  ;;  %v1252_v37 = vpack.c.bf16 %v1220_v23, %v1218_v13 }
 0x454   : > { %1444 = vst [vmem:[%s2945_s6 + $0xf0] sm:$0xff] %v1811_v7  ;;  %1480 = vmatprep.subr.bf16.mxu0 %v1253_v47  ;;  %1830 = vmatprep.subr.bf16.mxu1 %v1253_v47  ;;  %s2155_s6 = scalar_lea.vmem %s2154_s15, 8192 }
 0x455   : > { %1481 = vmatpush1.bf16.xpose.msra.mxu0 %v1252_v37  ;;  %1846 = vmatpush1.bf16.xpose.msra.mxu1 %v1252_v37  ;;  %p2157_p13 = scmp.lt.s32.totalorder %s2155_s6, %s2149_s3 }
 0x457   : > { %p2158_p2 = por %p2157_p13, %p2156_p6 }
 0x459   : > { %p2159_p5 = pnand %p2158_p2, %p2152_p0 }
 0x45c   : > { %1483 = vmatmul.mubr.bf16.vlgmr.msra.gmra.mrb[12].mxu0 %v427_v16  ;;  %1493 = vmatmul.mubr.bf16.vlgmr.msra.gmra.mrb[64].mxu1 %v429_v52 }
 0x45d   : > { %2162 = shalt.err (!%p2159_p5)
}
 0x45e   : > { %s2163_s17 = scalar_lea.hbm %s3093_s14, 4096  ;;  %s2167_s11 = scalar_lea.hbm %s3202_s5, 8192 }
 0x45f   : > { %p2164_p4 = scmp.ne.s32.totalorder %s3093_s14, %s2163_s17  ;;  %p2168_p12 = scmp.lt.u32.totalorder %s3093_s14, %s3202_s5 }
 0x460   : > { %p2169_p1 = scmp.lt.u32.totalorder %s2167_s11, %s2163_s17  ;;  %p2171_p8 = scmp.lt.u32.totalorder %s2163_s17, %s3093_s14 }
 0x461   : > { %p2165_p7 = pnand %p2164_p4, %p3303_p9 }
 0x462   : > { %p2170_p3 = por %p2169_p1, %p2168_p12 }
 0x463   : > { %p2166_p10 = pneg %p2165_p7 }
 0x464   : > { %p2172_p11 = por %p2171_p8, %p2170_p3 }
 0x466   : > { %p2173_p0 = pnand %p2172_p11, %p2166_p10 }
 0x468   : > { %2176 = shalt.err (!%p2173_p0)
}
 0x469   : > { %s2271_s3 = smov 128   ;;  %s2272_s29 = smov 8   ;;  %v1515_v48 = vld [vmem:[%s2427_s30] sm:$0xff]  ;;  %v1516_v60 = vld [vmem:[%s2427_s30 + $0x8] sm:$0xff]  ;;  %v1517_v57 = vld [vmem:[%s2427_s30 + $0x10] sm:$0xff] }
 0x46a   : > { %1850 = dma.vmem_to_hbm [thread:$0]  (%p3303_p9), %s3095_s10, 4096, %s3093_s14, %s1545_s16, %s2271_s3, %s2271_s3, %s2272_s29  }
 0x46b   : > { %s1503_s15 = sld [smem:[#allocation5]]  ;;  %v1519_v63 = vld [vmem:[%s2427_s30 + $0x20] sm:$0xff]  ;;  %s3125_s6 = scalar_lea.vmem [#allocation9], %s1710_s28  ;;  %v1520_v32 = vld [vmem:[%s2427_s30 + $0x28] sm:$0xff]  ;;  %v1521_v59 = vld [vmem:[%s2427_s30 + $0x30] sm:$0xff] }
 0x46c   : > { %s1560_s17 = sshll.u32 %s3125_s6, 4  ;;  %s1813_s10 = sshll.u32 %s2255_s23, 10  ;;  %v1518_v2 = vld [vmem:[%s2427_s30 + $0x18] sm:$0xff]  ;;  %s3135_s17 = int_to_ptr.vmem [resolvable:$true] %s1560_s17 }
 0x46d   : > { %v1522_v8 = vld [vmem:[%s2427_s30 + $0x38] sm:$0xff]  ;;  %s3142_s30 = scalar_lea.hbm %s3201_s4, %s1813_s10  ;;  %s1540_s14 = scalar_lea.sflag [#allocation8], %s2421_s26 }
 0x46e   : > { %s2177_s16 = scalar_lea.vmem %s3135_s17, 1024  ;;  %s2273_s18 = smov [#allocation9]  }
 0x46f   : > { %p2178_p6 = scmp.ne.s32.totalorder %s3135_s17, %s2177_s16  ;;  %s2181_s19 = sshll.u32 %s2273_s18, 4  ;;  %s2182_s19 = int_to_ptr.vmem [resolvable:$false] %s2181_s19 }
 0x470   : > { %s2183_s11 = scalar_lea.vmem %s2182_s19, 2048  ;;  %p2184_p5 = scmp.lt.s32.totalorder %s3135_s17, %s2182_s19 }
 0x471   : > { %v1504_v30 = vstv %s1503_s15  ;;  %p2179_p13 = pnand %p2178_p6, %p3303_p9  ;;  %p2185_p4 = scmp.lt.s32.totalorder %s2183_s11, %s2177_s16 }
 0x473   : > { %p2180_p2 = pneg %p2179_p13  ;;  %p2186_p7 = por %p2185_p4, %p2184_p5 }
 0x475   : > { %p2187_p10 = pnand %p2186_p7, %p2180_p2 }
 0x52f   : > { %v1484_v21 = vpop.f32.mrb[12].mxu0  ;;  %v1494_v36 = vpop.f32.mrb[64].mxu1 }
 0x530   : > { %v1505_v28 = vmul.f32 %v1504_v30, %v1484_v21  ;;  %v1509_v25 = vmul.f32 %v1504_v30, %v1494_v36  ;;  %v1486_v31 = vpop.f32.mrb[13].mxu0  ;;  %v1496_v33 = vpop.f32.mrb[65].mxu1 }
 0x531   : > { %v1506_v15 = vmul.f32 %v1504_v30, %v1486_v31  ;;  %v1510_v17 = vmul.f32 %v1504_v30, %v1496_v33  ;;  %v1488_v12 = vpop.f32.mrb[14].mxu0  ;;  %v1498_v16 = vpop.f32.mrb[66].mxu1 }
 0x532   : > { %v1523_v26 = vadd.f32 %v1515_v48, %v1505_v28  ;;  %v1527_v62 = vadd.f32 %v1519_v63, %v1509_v25  ;;  %v1507_v35 = vmul.f32 %v1504_v30, %v1488_v12  ;;  %v1511_v61 = vmul.f32 %v1504_v30, %v1498_v16  ;;  %v1490_v56 = vpop.f32.mrb[15].mxu0  ;;  %v1500_v53 = vpop.f32.mrb[67].mxu1 }
 0x533   : > { %v1524_v9 = vadd.f32 %v1516_v60, %v1506_v15  ;;  %v1528_v5 = vadd.f32 %v1520_v32, %v1510_v17  ;;  %v1508_v34 = vmul.f32 %v1504_v30, %v1490_v56  ;;  %v1512_v10 = vmul.f32 %v1504_v30, %v1500_v53 }
 0x534   : > { %1531 = vst [vmem:[%s3125_s6] sm:$0xff] %v1523_v26  ;;  %1535 = vst [vmem:[%s3125_s6 + $0x20] sm:$0xff] %v1527_v62  ;;  %v1525_v39 = vadd.f32 %v1517_v57, %v1507_v35  ;;  %v1529_v27 = vadd.f32 %v1521_v59, %v1511_v61 }
 0x535   : > { %1532 = vst [vmem:[%s3125_s6 + $0x8] sm:$0xff] %v1524_v9  ;;  %1536 = vst [vmem:[%s3125_s6 + $0x28] sm:$0xff] %v1528_v5  ;;  %v1526_v44 = vadd.f32 %v1518_v2, %v1508_v34  ;;  %v1530_v11 = vadd.f32 %v1522_v8, %v1512_v10 }
 0x536   : > { %1533 = vst [vmem:[%s3125_s6 + $0x10] sm:$0xff] %v1525_v39  ;;  %1537 = vst [vmem:[%s3125_s6 + $0x30] sm:$0xff] %v1529_v27 }
 0x537   : > { %1534 = vst [vmem:[%s3125_s6 + $0x18] sm:$0xff] %v1526_v44  ;;  %1538 = vst [vmem:[%s3125_s6 + $0x38] sm:$0xff] %v1530_v11 }
 0x538   : > { %2190 = shalt.err (!%p2187_p10)
}
 0x539   : > { %s2191_s12 = scalar_lea.hbm %s3142_s30, 1024  ;;  %s2195_s29 = scalar_lea.hbm %s3201_s4, 2048 }
 0x53a   : > { %p2192_p12 = scmp.ne.s32.totalorder %s3142_s30, %s2191_s12  ;;  %p2196_p8 = scmp.lt.u32.totalorder %s3142_s30, %s3201_s4 }
 0x53b   : > { %p2197_p11 = scmp.lt.u32.totalorder %s2195_s29, %s2191_s12  ;;  %p2199_p6 = scmp.lt.u32.totalorder %s2191_s12, %s3142_s30 }
 0x53c   : > { %p2193_p1 = pnand %p2192_p12, %p3303_p9 }
 0x53d   : > { %p2198_p0 = por %p2197_p11, %p2196_p8 }
 0x53e   : > { %p2194_p3 = pneg %p2193_p1 }
 0x53f   : > { %p2200_p13 = por %p2199_p6, %p2198_p0 }
 0x541   : > { %p2201_p2 = pnand %p2200_p13, %p2194_p3 }
 0x543   : > { %2204 = shalt.err (!%p2201_p2)
}
 0x544   : > { %s2274_s10 = smov 256   ;;  %s2275_s23 = smov 16  }
 0x545   : > { %1849 = dma.vmem_to_hbm [thread:$0]  (%p3303_p9), %s3135_s17, 1024, %s3142_s30, %s1540_s14, %s2274_s10, %s2274_s10, %s2275_s23  }
 0x546 PF: > { %s1594_s28 = sand.u32 1, %s2243_s20   ;;  %p3304_p5 = scmp.ne.s32.totalorder %s3235_s9, 0 }
 0x547   : > { %p3305_p4 = scmp.ge.s32.totalorder %s2263_s25, 2  ;;  %s1595_s16 = scalar_lea.sflag [#allocation8], %s1594_s28 }
 0x549   : > { %p1858_p7 = pnand %p3305_p4, %p3304_p5 }
 0x54b   : > { %2234 = dma.done.wait (!%p1858_p7), %s1595_s16, 1024  }
 0x54c   : > { %2236 = vsyncadd (!%p1858_p7), %s1595_s16, 4294966272  ;;  %s1604_s18 = scalar_lea.sflag [#allocation11], %s1594_s28 }
 0x54d   : > { %2238 = dma.done.wait (!%p1858_p7), %s1604_s18, 4096  }
 0x54e   : > { %2240 = vsyncadd (!%p1858_p7), %s1604_s18, 4294963200  ;;  %s26_s25 = sadd.s32 1, %s2263_s25   ;;  %s3306_s20 = smov %s2247_s21 }
 0x54f   : > { %p23_p10 = scmp.ge.s32.totalorder %s26_s25, 4   ;;  %s3307_s21 = smov %s2251_s22 }
 0x550   : > { %s3308_s22 = smov %s2365_s8  ;;  %s3309_s23 = smov %s2259_s24 }
 0x551   : > { %s3310_s24 = smov %s3312_s27  ;;  %25 = sbr.rel (!%p23_p10) target bundleno = 10 (0xa), region = 104 }
 0x558   :  { %1609 = vsyncpa [#allocation7], 1 }
 0x559   :  { %1611 = vsyncpa [#allocation7 + $0x1], 1 }
 0x55a   :  { %1612 = vsyncpa [#allocation8], 1 }
 0x55b   :  { %1614 = vsyncpa [#allocation8 + $0x1], 1 }
 0x55c   :  { %1615 = vsyncpa [#allocation11], 1 }
 0x55d   :  { %1617 = vsyncpa [#allocation11 + $0x1], 1 }

</bundles_post_ra>
